<compile_context>
chip_gen: v5e
topology: v5e:2x2
jax: 0.10.0
libtpu: 0.0.40
codegen_flags: <defaults>
</compile_context>

<pallas_src>
import functools

import jax
import jax.numpy as jnp
import numpy as np
from jax.experimental import pallas as pl
from jax.experimental.pallas import tpu as pltpu


def _sepconv_kernel(x_ref, dw_ref, pw_ref, bias_ref, o_ref, xpad_sc, ypad_sc,
                    *, H, W, C):
    """Fused depthwise3x3 + BN + ReLU6 + pointwise1x1 + BN for one image.

    x_ref   : (1, H, W*C)        lane-dense NHWC image (C innermost)
    dw_ref  : (9, W*C)           per-tap depthwise lane weights (BN1 scale folded)
    pw_ref  : (2C-1, W*C)        per-lane-shift pointwise weights (BN2 scale folded)
    bias_ref: (2, W*C)           BN1 / BN2 folded shifts, tiled to lanes
    o_ref   : (1, H, W*C)
    xpad_sc : (H+2, (W+2)*C)     zero halo scratch for the depthwise conv
    ypad_sc : (H, W*C + 2(C-1))  zero halo scratch for the pointwise lane shifts
    """
    WC = W * C

    # Zero the halo scratches, then drop the image into the interior.
    xpad_sc[...] = jnp.zeros_like(xpad_sc)
    ypad_sc[...] = jnp.zeros_like(ypad_sc)
    xpad_sc[1:H + 1, C:C + WC] = x_ref[0]

    # Depthwise 3x3 (BN1 scale already folded into dw_ref): 9 shifted slabs,
    # pure VPU fma on fully occupied vregs. Halo zeros handle the padding.
    acc = jnp.zeros((H, WC), jnp.float32)
    for ki in range(3):
        for kj in range(3):
            tap = ki * 3 + kj
            acc = acc + (xpad_sc[ki:ki + H, kj * C:kj * C + WC]
                         * dw_ref[tap:tap + 1, :])

    # BN1 shift + ReLU6.
    y = jnp.clip(acc + bias_ref[0:1, :], 0.0, 6.0)

    # Pointwise 1x1 (BN2 scale folded into pw_ref): for out lane l = w*C + co,
    # accumulate y[lane l + (ci - co)] * wpw[co, ci] over ci as 2C-1 lane-shifted
    # slabs. Group-boundary masking is baked into pw_ref (zero weights).
    ypad_sc[:, C - 1:C - 1 + WC] = y
    acc2 = jnp.zeros((H, WC), jnp.float32)
    for d in range(2 * C - 1):
        acc2 = acc2 + ypad_sc[:, d:d + WC] * pw_ref[d:d + 1, :]

    # BN2 shift; lane-dense (last dim = W*C) unmasked store.
    o_ref[0] = (acc2 + bias_ref[1:2, :]).astype(o_ref.dtype)


@jax.jit
def sepconv_forward(x_nchw, w_dw, w_pw, bn1, bn2):
    """x_nchw: (N, C, H, W). w_dw: (C, 1, 3, 3). w_pw: (C, C, 1, 1).

    bn1/bn2: dicts with gamma, beta, mean, var (each (C,)).
    Assumes in_channels == out_channels (MNASNet SepConv). Returns (N, C, H, W).
    """
    eps = 1e-5
    N, C, H, W = x_nchw.shape
    WC = W * C

    # Fold BN running stats into per-channel scale/shift (eval mode).
    s1 = (bn1["gamma"] / jnp.sqrt(bn1["var"] + eps)).astype(jnp.float32)
    b1 = (bn1["beta"] - bn1["mean"] * s1).astype(jnp.float32)
    s2 = (bn2["gamma"] / jnp.sqrt(bn2["var"] + eps)).astype(jnp.float32)
    b2 = (bn2["beta"] - bn2["mean"] * s2).astype(jnp.float32)

    # Depthwise weights (C,1,3,3) -> (3,3,C), fold BN1 scale, tile each 3x3 tap
    # to a (W*C,) lane vector -> (9, W*C).
    wdw = jnp.transpose(w_dw[:, 0, :, :], (1, 2, 0)).astype(jnp.float32)
    wdw = wdw * s1[None, None, :]
    dw_taps = jnp.tile(wdw.reshape(9, C), (1, W))                 # (9, W*C)

    # Pointwise (Cout,Cin,1,1) -> (Cout,Cin), fold BN2 scale per output channel,
    # expand into 2C-1 lane-shift weight vectors with group-boundary masking.
    wpw = w_pw[:, :, 0, 0].astype(jnp.float32) * s2[:, None]      # (Cout, Cin)
    co_l = np.arange(WC) % C                                      # lane -> c_out
    d_ar = np.arange(2 * C - 1)
    ci_dl = co_l[None, :] + d_ar[:, None] - (C - 1)               # (2C-1, W*C)
    valid = (ci_dl >= 0) & (ci_dl < C)
    ci_cl = np.clip(ci_dl, 0, C - 1)
    co_b = np.broadcast_to(co_l[None, :], ci_dl.shape)
    pw_taps = jnp.where(jnp.asarray(valid), wpw[co_b, ci_cl], 0.0)  # (2C-1, W*C)

    # Coalesced BN shifts, tiled to lanes: (2, W*C).
    bias = jnp.stack([jnp.tile(b1, W), jnp.tile(b2, W)])

    # NCHW -> lane-dense (N, H, W*C); channels innermost so the reshape is free.
    # TODO(synk): keeping NHWC across the whole network would remove these
    # wrapper transposes entirely.
    x_flat = jnp.transpose(x_nchw, (0, 2, 3, 1)).astype(jnp.float32)
    x_flat = x_flat.reshape(N, H, WC)

    kern = functools.partial(_sepconv_kernel, H=H, W=W, C=C)
    flops = N * H * W * C * (2 * 9 + 2 * (2 * C - 1))
    bytes_acc = 4 * (x_flat.size + N * H * WC
                     + dw_taps.size + pw_taps.size + bias.size)

    out_flat = pl.pallas_call(
        kern,
        out_shape=jax.ShapeDtypeStruct((N, H, WC), jnp.float32),
        grid_spec=pltpu.PrefetchScalarGridSpec(
            num_scalar_prefetch=0,
            grid=(N,),
            in_specs=[
                pl.BlockSpec((1, H, WC), lambda n: (n, 0, 0)),
                pl.BlockSpec((9, WC), lambda n: (0, 0)),
                pl.BlockSpec((2 * C - 1, WC), lambda n: (0, 0)),
                pl.BlockSpec((2, WC), lambda n: (0, 0)),
            ],
            out_specs=pl.BlockSpec((1, H, WC), lambda n: (n, 0, 0)),
            scratch_shapes=[
                pltpu.VMEM((H + 2, (W + 2) * C), jnp.float32),
                pltpu.VMEM((H, WC + 2 * (C - 1)), jnp.float32),
            ],
        ),
        compiler_params=pltpu.CompilerParams(
            dimension_semantics=("parallel",)),
        cost_estimate=pl.CostEstimate(flops=flops, transcendentals=0,
                                      bytes_accessed=bytes_acc),
    )(x_flat, dw_taps, pw_taps, bias)

    return jnp.transpose(out_flat.reshape(N, H, W, C), (0, 3, 1, 2))


def _reference_forward(x_nchw, w_dw, w_pw, bn1, bn2):
    """Pure-JAX (lax.conv) reference, eval-mode BN, for correctness check."""
    eps = 1e-5
    C = x_nchw.shape[1]

    y = jax.lax.conv_general_dilated(
        x_nchw, w_dw, window_strides=(1, 1), padding=((1, 1), (1, 1)),
        dimension_numbers=("NCHW", "OIHW", "NCHW"), feature_group_count=C)
    s1 = (bn1["gamma"] / jnp.sqrt(bn1["var"] + eps)).reshape(1, C, 1, 1)
    b1 = (bn1["beta"] - bn1["mean"] * bn1["gamma"] /
          jnp.sqrt(bn1["var"] + eps)).reshape(1, C, 1, 1)
    y = jnp.clip(y * s1 + b1, 0.0, 6.0)

    y = jax.lax.conv_general_dilated(
        y, w_pw, window_strides=(1, 1), padding=((0, 0), (0, 0)),
        dimension_numbers=("NCHW", "OIHW", "NCHW"))
    s2 = (bn2["gamma"] / jnp.sqrt(bn2["var"] + eps)).reshape(1, C, 1, 1)
    b2 = (bn2["beta"] - bn2["mean"] * bn2["gamma"] /
          jnp.sqrt(bn2["var"] + eps)).reshape(1, C, 1, 1)
    return y * s2 + b2


if __name__ == "__main__":
    key = jax.random.PRNGKey(0)
    N, C, H, W = 2, 8, 16, 16  # in_channels == out_channels == 8; W*C == 128

    (k_x, k_dw, k_pw, k_g1, k_b1, k_m1, k_v1,
     k_g2, k_b2, k_m2, k_v2) = jax.random.split(key, 11)

    x = jax.random.normal(k_x, (N, C, H, W), jnp.float32)
    w_dw = jax.random.normal(k_dw, (C, 1, 3, 3), jnp.float32) * 0.3
    w_pw = jax.random.normal(k_pw, (C, C, 1, 1), jnp.float32) * 0.3

    bn1 = dict(
        gamma=jax.random.uniform(k_g1, (C,), jnp.float32, 0.5, 1.5),
        beta=jax.random.normal(k_b1, (C,), jnp.float32) * 0.1,
        mean=jax.random.normal(k_m1, (C,), jnp.float32) * 0.1,
        var=jax.random.uniform(k_v1, (C,), jnp.float32, 0.5, 1.5),
    )
    bn2 = dict(
        gamma=jax.random.uniform(k_g2, (C,), jnp.float32, 0.5, 1.5),
        beta=jax.random.normal(k_b2, (C,), jnp.float32) * 0.1,
        mean=jax.random.normal(k_m2, (C,), jnp.float32) * 0.1,
        var=jax.random.uniform(k_v2, (C,), jnp.float32, 0.5, 1.5),
    )

    out = sepconv_forward(x, w_dw, w_pw, bn1, bn2)
    out = jax.block_until_ready(out)

    ref = jax.block_until_ready(_reference_forward(x, w_dw, w_pw, bn1, bn2))
    np.testing.assert_allclose(np.asarray(out), np.asarray(ref),
                               rtol=1e-4, atol=1e-4)

    print("KERNEL_OK")
</pallas_src>

<mosaic_0001>
module attributes {stable_mosaic.version = 11 : i64} {
  func.func @_sepconv_kernel(%arg0: i32, %arg1: memref<1x16x128xf32, #tpu.memory_space<vmem>>, %arg2: memref<9x128xf32, #tpu.memory_space<vmem>>, %arg3: memref<15x128xf32, #tpu.memory_space<vmem>>, %arg4: memref<2x128xf32, #tpu.memory_space<vmem>>, %arg5: memref<1x16x128xf32, #tpu.memory_space<vmem>>, %arg6: memref<18x144xf32, #tpu.memory_space<vmem>>, %arg7: memref<16x142xf32, #tpu.memory_space<vmem>>) attributes {dimension_semantics = [#tpu.dimension_semantics<parallel>], iteration_bounds = array<i64: 2>, scalar_prefetch = 0 : i64, scratch_operands = 2 : i64, tpu.core_type = #tpu.core_type<tc>, window_params = [{transform_indices = @transform_0, window_bounds = array<i64: 1, 16, 128>}, {pipeline_mode = #tpu.pipeline_mode<synchronous>, transform_indices = @transform_1, window_bounds = array<i64: 9, 128>}, {pipeline_mode = #tpu.pipeline_mode<synchronous>, transform_indices = @transform_2, window_bounds = array<i64: 15, 128>}, {pipeline_mode = #tpu.pipeline_mode<synchronous>, transform_indices = @transform_3, window_bounds = array<i64: 2, 128>}, {transform_indices = @transform_4, window_bounds = array<i64: 1, 16, 128>}]} {
    %cst = arith.constant 0.000000e+00 : f32
    %0 = vector.broadcast %cst : f32 to vector<18x144xf32>
    %c0 = arith.constant 0 : index
    %c0_0 = arith.constant 0 : index
    %1 = vector.load %arg6[%c0, %c0_0] : memref<18x144xf32, #tpu.memory_space<vmem>>, vector<18x144xf32>
    tpu.vector_store %arg6[%c0, %c0_0], %0 {strides = array<i32>} : memref<18x144xf32, #tpu.memory_space<vmem>>, vector<18x144xf32>,
    %cst_1 = arith.constant 0.000000e+00 : f32
    %2 = vector.broadcast %cst_1 : f32 to vector<16x142xf32>
    %c0_2 = arith.constant 0 : index
    %c0_3 = arith.constant 0 : index
    %3 = vector.load %arg7[%c0_2, %c0_3] : memref<16x142xf32, #tpu.memory_space<vmem>>, vector<16x142xf32>
    tpu.vector_store %arg7[%c0_2, %c0_3], %2 {strides = array<i32>} : memref<16x142xf32, #tpu.memory_space<vmem>>, vector<16x142xf32>,
    %c0_4 = arith.constant 0 : index
    %c0_5 = arith.constant 0 : index
    %c0_6 = arith.constant 0 : index
    %4 = vector.load %arg1[%c0_4, %c0_5, %c0_6] : memref<1x16x128xf32, #tpu.memory_space<vmem>>, vector<1x16x128xf32>
    %5 = vector.shape_cast %4 : vector<1x16x128xf32> to vector<16x128xf32>
    %c1 = arith.constant 1 : index
    %c8 = arith.constant 8 : index
    %6 = vector.load %arg6[%c1, %c8] : memref<18x144xf32, #tpu.memory_space<vmem>>, vector<16x128xf32>
    tpu.vector_store %arg6[%c1, %c8], %5 {strides = array<i32>} : memref<18x144xf32, #tpu.memory_space<vmem>>, vector<16x128xf32>,
    %cst_7 = arith.constant 0.000000e+00 : f32
    %7 = vector.broadcast %cst_7 : f32 to vector<16x128xf32>
    %c0_8 = arith.constant 0 : index
    %c0_9 = arith.constant 0 : index
    %8 = vector.load %arg6[%c0_8, %c0_9] : memref<18x144xf32, #tpu.memory_space<vmem>>, vector<16x128xf32>
    %c0_10 = arith.constant 0 : index
    %c0_11 = arith.constant 0 : index
    %9 = vector.load %arg2[%c0_10, %c0_11] : memref<9x128xf32, #tpu.memory_space<vmem>>, vector<1x128xf32>
    %10 = vector.broadcast %9 : vector<1x128xf32> to vector<16x128xf32>
    %11 = arith.mulf %8, %10 : vector<16x128xf32>
    %12 = arith.addf %7, %11 : vector<16x128xf32>
    %c0_12 = arith.constant 0 : index
    %c8_13 = arith.constant 8 : index
    %13 = vector.load %arg6[%c0_12, %c8_13] : memref<18x144xf32, #tpu.memory_space<vmem>>, vector<16x128xf32>
    %c1_14 = arith.constant 1 : index
    %c0_15 = arith.constant 0 : index
    %14 = vector.load %arg2[%c1_14, %c0_15] : memref<9x128xf32, #tpu.memory_space<vmem>>, vector<1x128xf32>
    %15 = vector.broadcast %14 : vector<1x128xf32> to vector<16x128xf32>
    %16 = arith.mulf %13, %15 : vector<16x128xf32>
    %17 = arith.addf %12, %16 : vector<16x128xf32>
    %c0_16 = arith.constant 0 : index
    %c16 = arith.constant 16 : index
    %18 = vector.load %arg6[%c0_16, %c16] : memref<18x144xf32, #tpu.memory_space<vmem>>, vector<16x128xf32>
    %c2 = arith.constant 2 : index
    %c0_17 = arith.constant 0 : index
    %19 = vector.load %arg2[%c2, %c0_17] : memref<9x128xf32, #tpu.memory_space<vmem>>, vector<1x128xf32>
    %20 = vector.broadcast %19 : vector<1x128xf32> to vector<16x128xf32>
    %21 = arith.mulf %18, %20 : vector<16x128xf32>
    %22 = arith.addf %17, %21 : vector<16x128xf32>
    %c1_18 = arith.constant 1 : index
    %c0_19 = arith.constant 0 : index
    %23 = vector.load %arg6[%c1_18, %c0_19] : memref<18x144xf32, #tpu.memory_space<vmem>>, vector<16x128xf32>
    %c3 = arith.constant 3 : index
    %c0_20 = arith.constant 0 : index
    %24 = vector.load %arg2[%c3, %c0_20] : memref<9x128xf32, #tpu.memory_space<vmem>>, vector<1x128xf32>
    %25 = vector.broadcast %24 : vector<1x128xf32> to vector<16x128xf32>
    %26 = arith.mulf %23, %25 : vector<16x128xf32>
    %27 = arith.addf %22, %26 : vector<16x128xf32>
    %c1_21 = arith.constant 1 : index
    %c8_22 = arith.constant 8 : index
    %28 = vector.load %arg6[%c1_21, %c8_22] : memref<18x144xf32, #tpu.memory_space<vmem>>, vector<16x128xf32>
    %c4 = arith.constant 4 : index
    %c0_23 = arith.constant 0 : index
    %29 = vector.load %arg2[%c4, %c0_23] : memref<9x128xf32, #tpu.memory_space<vmem>>, vector<1x128xf32>
    %30 = vector.broadcast %29 : vector<1x128xf32> to vector<16x128xf32>
    %31 = arith.mulf %28, %30 : vector<16x128xf32>
    %32 = arith.addf %27, %31 : vector<16x128xf32>
    %c1_24 = arith.constant 1 : index
    %c16_25 = arith.constant 16 : index
    %33 = vector.load %arg6[%c1_24, %c16_25] : memref<18x144xf32, #tpu.memory_space<vmem>>, vector<16x128xf32>
    %c5 = arith.constant 5 : index
    %c0_26 = arith.constant 0 : index
    %34 = vector.load %arg2[%c5, %c0_26] : memref<9x128xf32, #tpu.memory_space<vmem>>, vector<1x128xf32>
    %35 = vector.broadcast %34 : vector<1x128xf32> to vector<16x128xf32>
    %36 = arith.mulf %33, %35 : vector<16x128xf32>
    %37 = arith.addf %32, %36 : vector<16x128xf32>
    %c2_27 = arith.constant 2 : index
    %c0_28 = arith.constant 0 : index
    %38 = vector.load %arg6[%c2_27, %c0_28] : memref<18x144xf32, #tpu.memory_space<vmem>>, vector<16x128xf32>
    %c6 = arith.constant 6 : index
    %c0_29 = arith.constant 0 : index
    %39 = vector.load %arg2[%c6, %c0_29] : memref<9x128xf32, #tpu.memory_space<vmem>>, vector<1x128xf32>
    %40 = vector.broadcast %39 : vector<1x128xf32> to vector<16x128xf32>
    %41 = arith.mulf %38, %40 : vector<16x128xf32>
    %42 = arith.addf %37, %41 : vector<16x128xf32>
    %c2_30 = arith.constant 2 : index
    %c8_31 = arith.constant 8 : index
    %43 = vector.load %arg6[%c2_30, %c8_31] : memref<18x144xf32, #tpu.memory_space<vmem>>, vector<16x128xf32>
    %c7 = arith.constant 7 : index
    %c0_32 = arith.constant 0 : index
    %44 = vector.load %arg2[%c7, %c0_32] : memref<9x128xf32, #tpu.memory_space<vmem>>, vector<1x128xf32>
    %45 = vector.broadcast %44 : vector<1x128xf32> to vector<16x128xf32>
    %46 = arith.mulf %43, %45 : vector<16x128xf32>
    %47 = arith.addf %42, %46 : vector<16x128xf32>
    %c2_33 = arith.constant 2 : index
    %c16_34 = arith.constant 16 : index
    %48 = vector.load %arg6[%c2_33, %c16_34] : memref<18x144xf32, #tpu.memory_space<vmem>>, vector<16x128xf32>
    %c8_35 = arith.constant 8 : index
    %c0_36 = arith.constant 0 : index
    %49 = vector.load %arg2[%c8_35, %c0_36] : memref<9x128xf32, #tpu.memory_space<vmem>>, vector<1x128xf32>
    %50 = vector.broadcast %49 : vector<1x128xf32> to vector<16x128xf32>
    %51 = arith.mulf %48, %50 : vector<16x128xf32>
    %52 = arith.addf %47, %51 : vector<16x128xf32>
    %c0_37 = arith.constant 0 : index
    %c0_38 = arith.constant 0 : index
    %53 = vector.load %arg4[%c0_37, %c0_38] : memref<2x128xf32, #tpu.memory_space<vmem>>, vector<1x128xf32>
    %54 = vector.broadcast %53 : vector<1x128xf32> to vector<16x128xf32>
    %55 = arith.addf %52, %54 : vector<16x128xf32>
    %cst_39 = arith.constant 0.000000e+00 : f32
    %cst_40 = arith.constant 6.000000e+00 : f32
    %56 = vector.broadcast %cst_39 : f32 to vector<16x128xf32>
    %57 = arith.maximumf %56, %55 : vector<16x128xf32>
    %58 = vector.broadcast %cst_40 : f32 to vector<16x128xf32>
    %59 = arith.minimumf %58, %57 : vector<16x128xf32>
    %c0_41 = arith.constant 0 : index
    %c7_42 = arith.constant 7 : index
    %60 = vector.load %arg7[%c0_41, %c7_42] : memref<16x142xf32, #tpu.memory_space<vmem>>, vector<16x128xf32>
    tpu.vector_store %arg7[%c0_41, %c7_42], %59 {strides = array<i32>} : memref<16x142xf32, #tpu.memory_space<vmem>>, vector<16x128xf32>,
    %cst_43 = arith.constant 0.000000e+00 : f32
    %61 = vector.broadcast %cst_43 : f32 to vector<16x128xf32>
    %c0_44 = arith.constant 0 : index
    %c0_45 = arith.constant 0 : index
    %62 = vector.load %arg7[%c0_44, %c0_45] : memref<16x142xf32, #tpu.memory_space<vmem>>, vector<16x128xf32>
    %c0_46 = arith.constant 0 : index
    %c0_47 = arith.constant 0 : index
    %63 = vector.load %arg3[%c0_46, %c0_47] : memref<15x128xf32, #tpu.memory_space<vmem>>, vector<1x128xf32>
    %64 = vector.broadcast %63 : vector<1x128xf32> to vector<16x128xf32>
    %65 = arith.mulf %62, %64 : vector<16x128xf32>
    %66 = arith.addf %61, %65 : vector<16x128xf32>
    %c0_48 = arith.constant 0 : index
    %c1_49 = arith.constant 1 : index
    %67 = vector.load %arg7[%c0_48, %c1_49] : memref<16x142xf32, #tpu.memory_space<vmem>>, vector<16x128xf32>
    %c1_50 = arith.constant 1 : index
    %c0_51 = arith.constant 0 : index
    %68 = vector.load %arg3[%c1_50, %c0_51] : memref<15x128xf32, #tpu.memory_space<vmem>>, vector<1x128xf32>
    %69 = vector.broadcast %68 : vector<1x128xf32> to vector<16x128xf32>
    %70 = arith.mulf %67, %69 : vector<16x128xf32>
    %71 = arith.addf %66, %70 : vector<16x128xf32>
    %c0_52 = arith.constant 0 : index
    %c2_53 = arith.constant 2 : index
    %72 = vector.load %arg7[%c0_52, %c2_53] : memref<16x142xf32, #tpu.memory_space<vmem>>, vector<16x128xf32>
    %c2_54 = arith.constant 2 : index
    %c0_55 = arith.constant 0 : index
    %73 = vector.load %arg3[%c2_54, %c0_55] : memref<15x128xf32, #tpu.memory_space<vmem>>, vector<1x128xf32>
    %74 = vector.broadcast %73 : vector<1x128xf32> to vector<16x128xf32>
    %75 = arith.mulf %72, %74 : vector<16x128xf32>
    %76 = arith.addf %71, %75 : vector<16x128xf32>
    %c0_56 = arith.constant 0 : index
    %c3_57 = arith.constant 3 : index
    %77 = vector.load %arg7[%c0_56, %c3_57] : memref<16x142xf32, #tpu.memory_space<vmem>>, vector<16x128xf32>
    %c3_58 = arith.constant 3 : index
    %c0_59 = arith.constant 0 : index
    %78 = vector.load %arg3[%c3_58, %c0_59] : memref<15x128xf32, #tpu.memory_space<vmem>>, vector<1x128xf32>
    %79 = vector.broadcast %78 : vector<1x128xf32> to vector<16x128xf32>
    %80 = arith.mulf %77, %79 : vector<16x128xf32>
    %81 = arith.addf %76, %80 : vector<16x128xf32>
    %c0_60 = arith.constant 0 : index
    %c4_61 = arith.constant 4 : index
    %82 = vector.load %arg7[%c0_60, %c4_61] : memref<16x142xf32, #tpu.memory_space<vmem>>, vector<16x128xf32>
    %c4_62 = arith.constant 4 : index
    %c0_63 = arith.constant 0 : index
    %83 = vector.load %arg3[%c4_62, %c0_63] : memref<15x128xf32, #tpu.memory_space<vmem>>, vector<1x128xf32>
    %84 = vector.broadcast %83 : vector<1x128xf32> to vector<16x128xf32>
    %85 = arith.mulf %82, %84 : vector<16x128xf32>
    %86 = arith.addf %81, %85 : vector<16x128xf32>
    %c0_64 = arith.constant 0 : index
    %c5_65 = arith.constant 5 : index
    %87 = vector.load %arg7[%c0_64, %c5_65] : memref<16x142xf32, #tpu.memory_space<vmem>>, vector<16x128xf32>
    %c5_66 = arith.constant 5 : index
    %c0_67 = arith.constant 0 : index
    %88 = vector.load %arg3[%c5_66, %c0_67] : memref<15x128xf32, #tpu.memory_space<vmem>>, vector<1x128xf32>
    %89 = vector.broadcast %88 : vector<1x128xf32> to vector<16x128xf32>
    %90 = arith.mulf %87, %89 : vector<16x128xf32>
    %91 = arith.addf %86, %90 : vector<16x128xf32>
    %c0_68 = arith.constant 0 : index
    %c6_69 = arith.constant 6 : index
    %92 = vector.load %arg7[%c0_68, %c6_69] : memref<16x142xf32, #tpu.memory_space<vmem>>, vector<16x128xf32>
    %c6_70 = arith.constant 6 : index
    %c0_71 = arith.constant 0 : index
    %93 = vector.load %arg3[%c6_70, %c0_71] : memref<15x128xf32, #tpu.memory_space<vmem>>, vector<1x128xf32>
    %94 = vector.broadcast %93 : vector<1x128xf32> to vector<16x128xf32>
    %95 = arith.mulf %92, %94 : vector<16x128xf32>
    %96 = arith.addf %91, %95 : vector<16x128xf32>
    %c0_72 = arith.constant 0 : index
    %c7_73 = arith.constant 7 : index
    %97 = vector.load %arg7[%c0_72, %c7_73] : memref<16x142xf32, #tpu.memory_space<vmem>>, vector<16x128xf32>
    %c7_74 = arith.constant 7 : index
    %c0_75 = arith.constant 0 : index
    %98 = vector.load %arg3[%c7_74, %c0_75] : memref<15x128xf32, #tpu.memory_space<vmem>>, vector<1x128xf32>
    %99 = vector.broadcast %98 : vector<1x128xf32> to vector<16x128xf32>
    %100 = arith.mulf %97, %99 : vector<16x128xf32>
    %101 = arith.addf %96, %100 : vector<16x128xf32>
    %c0_76 = arith.constant 0 : index
    %c8_77 = arith.constant 8 : index
    %102 = vector.load %arg7[%c0_76, %c8_77] : memref<16x142xf32, #tpu.memory_space<vmem>>, vector<16x128xf32>
    %c8_78 = arith.constant 8 : index
    %c0_79 = arith.constant 0 : index
    %103 = vector.load %arg3[%c8_78, %c0_79] : memref<15x128xf32, #tpu.memory_space<vmem>>, vector<1x128xf32>
    %104 = vector.broadcast %103 : vector<1x128xf32> to vector<16x128xf32>
    %105 = arith.mulf %102, %104 : vector<16x128xf32>
    %106 = arith.addf %101, %105 : vector<16x128xf32>
    %c0_80 = arith.constant 0 : index
    %c9 = arith.constant 9 : index
    %107 = vector.load %arg7[%c0_80, %c9] : memref<16x142xf32, #tpu.memory_space<vmem>>, vector<16x128xf32>
    %c9_81 = arith.constant 9 : index
    %c0_82 = arith.constant 0 : index
    %108 = vector.load %arg3[%c9_81, %c0_82] : memref<15x128xf32, #tpu.memory_space<vmem>>, vector<1x128xf32>
    %109 = vector.broadcast %108 : vector<1x128xf32> to vector<16x128xf32>
    %110 = arith.mulf %107, %109 : vector<16x128xf32>
    %111 = arith.addf %106, %110 : vector<16x128xf32>
    %c0_83 = arith.constant 0 : index
    %c10 = arith.constant 10 : index
    %112 = vector.load %arg7[%c0_83, %c10] : memref<16x142xf32, #tpu.memory_space<vmem>>, vector<16x128xf32>
    %c10_84 = arith.constant 10 : index
    %c0_85 = arith.constant 0 : index
    %113 = vector.load %arg3[%c10_84, %c0_85] : memref<15x128xf32, #tpu.memory_space<vmem>>, vector<1x128xf32>
    %114 = vector.broadcast %113 : vector<1x128xf32> to vector<16x128xf32>
    %115 = arith.mulf %112, %114 : vector<16x128xf32>
    %116 = arith.addf %111, %115 : vector<16x128xf32>
    %c0_86 = arith.constant 0 : index
    %c11 = arith.constant 11 : index
    %117 = vector.load %arg7[%c0_86, %c11] : memref<16x142xf32, #tpu.memory_space<vmem>>, vector<16x128xf32>
    %c11_87 = arith.constant 11 : index
    %c0_88 = arith.constant 0 : index
    %118 = vector.load %arg3[%c11_87, %c0_88] : memref<15x128xf32, #tpu.memory_space<vmem>>, vector<1x128xf32>
    %119 = vector.broadcast %118 : vector<1x128xf32> to vector<16x128xf32>
    %120 = arith.mulf %117, %119 : vector<16x128xf32>
    %121 = arith.addf %116, %120 : vector<16x128xf32>
    %c0_89 = arith.constant 0 : index
    %c12 = arith.constant 12 : index
    %122 = vector.load %arg7[%c0_89, %c12] : memref<16x142xf32, #tpu.memory_space<vmem>>, vector<16x128xf32>
    %c12_90 = arith.constant 12 : index
    %c0_91 = arith.constant 0 : index
    %123 = vector.load %arg3[%c12_90, %c0_91] : memref<15x128xf32, #tpu.memory_space<vmem>>, vector<1x128xf32>
    %124 = vector.broadcast %123 : vector<1x128xf32> to vector<16x128xf32>
    %125 = arith.mulf %122, %124 : vector<16x128xf32>
    %126 = arith.addf %121, %125 : vector<16x128xf32>
    %c0_92 = arith.constant 0 : index
    %c13 = arith.constant 13 : index
    %127 = vector.load %arg7[%c0_92, %c13] : memref<16x142xf32, #tpu.memory_space<vmem>>, vector<16x128xf32>
    %c13_93 = arith.constant 13 : index
    %c0_94 = arith.constant 0 : index
    %128 = vector.load %arg3[%c13_93, %c0_94] : memref<15x128xf32, #tpu.memory_space<vmem>>, vector<1x128xf32>
    %129 = vector.broadcast %128 : vector<1x128xf32> to vector<16x128xf32>
    %130 = arith.mulf %127, %129 : vector<16x128xf32>
    %131 = arith.addf %126, %130 : vector<16x128xf32>
    %c0_95 = arith.constant 0 : index
    %c14 = arith.constant 14 : index
    %132 = vector.load %arg7[%c0_95, %c14] : memref<16x142xf32, #tpu.memory_space<vmem>>, vector<16x128xf32>
    %c14_96 = arith.constant 14 : index
    %c0_97 = arith.constant 0 : index
    %133 = vector.load %arg3[%c14_96, %c0_97] : memref<15x128xf32, #tpu.memory_space<vmem>>, vector<1x128xf32>
    %134 = vector.broadcast %133 : vector<1x128xf32> to vector<16x128xf32>
    %135 = arith.mulf %132, %134 : vector<16x128xf32>
    %136 = arith.addf %131, %135 : vector<16x128xf32>
    %c1_98 = arith.constant 1 : index
    %c0_99 = arith.constant 0 : index
    %137 = vector.load %arg4[%c1_98, %c0_99] : memref<2x128xf32, #tpu.memory_space<vmem>>, vector<1x128xf32>
    %138 = vector.broadcast %137 : vector<1x128xf32> to vector<16x128xf32>
    %139 = arith.addf %136, %138 : vector<16x128xf32>
    %c0_100 = arith.constant 0 : index
    %c0_101 = arith.constant 0 : index
    %c0_102 = arith.constant 0 : index
    %140 = vector.load %arg5[%c0_100, %c0_101, %c0_102] : memref<1x16x128xf32, #tpu.memory_space<vmem>>, vector<1x16x128xf32>
    %141 = vector.shape_cast %140 : vector<1x16x128xf32> to vector<16x128xf32>
    %142 = vector.shape_cast %139 : vector<16x128xf32> to vector<1x16x128xf32>
    tpu.vector_store %arg5[%c0_100, %c0_101, %c0_102], %142 {strides = array<i32>} : memref<1x16x128xf32, #tpu.memory_space<vmem>>, vector<1x16x128xf32>,
    return
  }
  func.func @transform_0(%arg0: i32) -> (i32, i32, i32) {
    %c0_i32 = arith.constant 0 : i32
    %c0_i32_0 = arith.constant 0 : i32
    %c0_i32_1 = arith.constant 0 : i32
    return %arg0, %c0_i32, %c0_i32_0 : i32, i32, i32
  }
  func.func @transform_1(%arg0: i32) -> (i32, i32) {
    %c0_i32 = arith.constant 0 : i32
    %c0_i32_0 = arith.constant 0 : i32
    %c0_i32_1 = arith.constant 0 : i32
    return %c0_i32, %c0_i32_0 : i32, i32
  }
  func.func @transform_2(%arg0: i32) -> (i32, i32) {
    %c0_i32 = arith.constant 0 : i32
    %c0_i32_0 = arith.constant 0 : i32
    %c0_i32_1 = arith.constant 0 : i32
    return %c0_i32, %c0_i32_0 : i32, i32
  }
  func.func @transform_3(%arg0: i32) -> (i32, i32) {
    %c0_i32 = arith.constant 0 : i32
    %c0_i32_0 = arith.constant 0 : i32
    %c0_i32_1 = arith.constant 0 : i32
    return %c0_i32, %c0_i32_0 : i32, i32
  }
  func.func @transform_4(%arg0: i32) -> (i32, i32, i32) {
    %c0_i32 = arith.constant 0 : i32
    %c0_i32_0 = arith.constant 0 : i32
    %c0_i32_1 = arith.constant 0 : i32
    return %arg0, %c0_i32, %c0_i32_0 : i32, i32, i32
  }
}

</mosaic_0001>

<bundles_post_ra>
// kernel: tile.25
= control target key start
LH: loop header
LB: loop body
LE: loop exit
PB: predicated region body
PF: predicated region fallthrough
CT: control target
= control target key end

     0   :  { %s28_s0 = inlined_call_operand.vmem [shape: f32[8], index: 0, kind: input, shape index: {}]   ;;  %s29_s1 = inlined_call_operand.vmem [shape: f32[16,8], index: 1, kind: output, shape index: {}]  }
   0x1   :  { %v4_v0 = vld [vmem:[%s28_s0] ss:$0 sm:$0xff] }
   0x2   :  { %5 = vst [vmem:[%s29_s1] sm:$0xff] %v4_v0 }
   0x3   :  { %8 = vst [vmem:[%s29_s1 + $0x8] sm:$0xff] %v4_v0 }

// kernel: tile.27
= control target key start
LH: loop header
LB: loop body
LE: loop exit
PB: predicated region body
PF: predicated region fallthrough
CT: control target
= control target key end

     0   :  { %s131_s10 = smov 120   ;;  %s132_s11 = smov 104   ;;  %vm3_vm0 = vcmask 64512   ;;  %vm9_vm1 = vcmask 1048512   ;;  %vm15_vm2 = vcmask 982912   ;;  %vm21_vm3 = vcmask 917312   ;;  %s207_s0 = inlined_call_operand.vmem [shape: f32[16,8], index: 0, kind: input, shape index: {}]   ;;  %s208_s1 = inlined_call_operand.vmem [shape: f32[1,128], index: 1, kind: output, shape index: {}]  }
   0x1   :  { %v101_v0 = vld [vmem:[%s207_s0 + $0xf] sm:$0x1]   ;;  %v103_v1 = vld [vmem:[%s207_s0 + $0xd] sm:$0x1]   ;;  %v105_v2 = vld [vmem:[%s207_s0 + $0xb] sm:$0x1]  }
   0x2   :  { %7 = vrot.lane.b32.xlu0 %v101_v0, %s131_s10  ;;  %19 = vrot.lane.b32.xlu1 %v103_v1, %s132_s11  ;;  %s133_s14 = smov 88   ;;  %v102_v3 = vld [vmem:[%s207_s0 + $0xe] sm:$0x1]   ;;  %v104_v4 = vld [vmem:[%s207_s0 + $0xc] sm:$0x1]   ;;  %s134_s19 = smov 112  }
   0x3   :  { %31 = vrot.lane.b32.xlu2 %v105_v2, %s133_s14  ;;  %s135_s20 = smov 96   ;;  %v106_v5 = vld [vmem:[%s207_s0 + $0xa] sm:$0x1]   ;;  %s136_s23 = smov 80   ;;  %v107_v6 = vld [vmem:[%s207_s0 + $0x9] sm:$0x1]  }
   0x4   :  { %v108_v7 = vld [vmem:[%s207_s0 + $0x8] sm:$0x1]   ;;  %s137_s28 = smov 72   ;;  %s138_s29 = smov 64   ;;  %v109_v8 = vld [vmem:[%s207_s0 + $0x7] sm:$0x1]  }
   0x5   :  { %s139_s3 = smov 56   ;;  %v110_v9 = vld [vmem:[%s207_s0 + $0x6] sm:$0x1]   ;;  %v111_v10 = vld [vmem:[%s207_s0 + $0x5] sm:$0x1]   ;;  %s140_s8 = smov 48  }
   0x6   :  { %s141_s9 = smov 40   ;;  %v112_v11 = vld [vmem:[%s207_s0 + $0x4] sm:$0x1]   ;;  %s142_s12 = smov 32   ;;  %v113_v12 = vld [vmem:[%s207_s0 + $0x3] sm:$0x1]  }
   0x7   :  { %v114_v13 = vld [vmem:[%s207_s0 + $0x2] sm:$0x1]   ;;  %s143_s17 = smov 24   ;;  %s144_s18 = smov 16   ;;  %v115_v14 = vld [vmem:[%s207_s0 + $0x1] sm:$0x1]  }
   0x8   :  { %s145_s21 = smov 8   ;;  %v2_v15 = vld [vmem:[%s207_s0] sm:$0x1]   ;;  %vm27_vm4 = vcmask 851712   ;;  %vm33_vm5 = vcmask 786112   ;;  %vm39_vm6 = vcmask 720512  }
   0x9   :  { %4 = vst.msk [vmem:[#allocation0] sm:$0x1] %vm3_vm0, %v2_v15   ;;  %vm45_vm7 = vcmask 654912   ;;  %vm51_vm8 = vcmask 589312   ;;  %vm57_vm9 = vcmask 523712   ;;  %vm63_vm10 = vcmask 458112  }
   0xa   :  { %13 = vrot.lane.b32.xlu0 %v102_v3, %s134_s19  ;;  %25 = vrot.lane.b32.xlu1 %v104_v4, %s135_s20  ;;  %vm69_vm11 = vcmask 392512   ;;  %vm75_vm12 = vcmask 326912   ;;  %vm81_vm13 = vcmask 261312   ;;  %vm87_vm14 = vcmask 195712  }
   0xb   :  { %37 = vrot.lane.b32.xlu2 %v106_v5, %s136_s23  ;;  %vm93_vm15 = vcmask 130112  }
  0x12   :  { %43 = vrot.lane.b32.xlu0 %v107_v6, %s137_s28  ;;  %49 = vrot.lane.b32.xlu1 %v108_v7, %s138_s29 }
  0x13   :  { %55 = vrot.lane.b32.xlu2 %v109_v8, %s139_s3 }
  0x1a   :  { %61 = vrot.lane.b32.xlu0 %v110_v9, %s140_s8  ;;  %67 = vrot.lane.b32.xlu1 %v111_v10, %s141_s9 }
  0x1b   :  { %73 = vrot.lane.b32.xlu2 %v112_v11, %s142_s12 }
  0x22   :  { %79 = vrot.lane.b32.xlu0 %v113_v12, %s143_s17  ;;  %85 = vrot.lane.b32.xlu1 %v114_v13, %s144_s18 }
  0x23   :  { %91 = vrot.lane.b32.xlu2 %v115_v14, %s145_s21 }
  0x5d   :  { %v32_v16 = vpop.permute.xlu2 %31  }
  0x65   :  { %v38_v17 = vpop.permute.xlu2 %37  }
  0x6d   :  { %v56_v18 = vpop.permute.xlu2 %55  }
  0x74   :  { %v8_v19 = vpop.permute.xlu0 %7   ;;  %v20_v20 = vpop.permute.xlu1 %19  }
  0x75   :  { %10 = vst.msk [vmem:[#allocation0] sm:$0x1] %vm9_vm1, %v8_v19   ;;  %v74_v21 = vpop.permute.xlu2 %73  }
  0x7c   :  { %v14_v22 = vpop.permute.xlu0 %13   ;;  %v26_v23 = vpop.permute.xlu1 %25  }
  0x7d   :  { %16 = vst.msk [vmem:[#allocation0] sm:$0x1] %vm15_vm2, %v14_v22   ;;  %v92_v24 = vpop.permute.xlu2 %91  }
  0x7e   :  { %22 = vst.msk [vmem:[#allocation0] sm:$0x1] %vm21_vm3, %v20_v20  }
  0x7f   :  { %28 = vst.msk [vmem:[#allocation0] sm:$0x1] %vm27_vm4, %v26_v23  }
  0x80   :  { %34 = vst.msk [vmem:[#allocation0] sm:$0x1] %vm33_vm5, %v32_v16  }
  0x81   :  { %40 = vst.msk [vmem:[#allocation0] sm:$0x1] %vm39_vm6, %v38_v17  }
  0x84   :  { %v44_v25 = vpop.permute.xlu0 %43   ;;  %v50_v26 = vpop.permute.xlu1 %49  }
  0x85   :  { %46 = vst.msk [vmem:[#allocation0] sm:$0x1] %vm45_vm7, %v44_v25  }
  0x86   :  { %52 = vst.msk [vmem:[#allocation0] sm:$0x1] %vm51_vm8, %v50_v26  }
  0x87   :  { %58 = vst.msk [vmem:[#allocation0] sm:$0x1] %vm57_vm9, %v56_v18  }
  0x8c   :  { %v62_v27 = vpop.permute.xlu0 %61   ;;  %v68_v28 = vpop.permute.xlu1 %67  }
  0x8d   :  { %64 = vst.msk [vmem:[#allocation0] sm:$0x1] %vm63_vm10, %v62_v27  }
  0x8e   :  { %70 = vst.msk [vmem:[#allocation0] sm:$0x1] %vm69_vm11, %v68_v28  }
  0x8f   :  { %76 = vst.msk [vmem:[#allocation0] sm:$0x1] %vm75_vm12, %v74_v21  }
  0x94   :  { %v80_v29 = vpop.permute.xlu0 %79   ;;  %v86_v30 = vpop.permute.xlu1 %85  }
  0x95   :  { %82 = vst.msk [vmem:[#allocation0] sm:$0x1] %vm81_vm13, %v80_v29  }
  0x96   :  { %88 = vst.msk [vmem:[#allocation0] sm:$0x1] %vm87_vm14, %v86_v30  }
  0x97   :  { %94 = vst.msk [vmem:[#allocation0] sm:$0x1] %vm93_vm15, %v92_v24  }
  0x9e   :  { %v97_v31 = vld [vmem:[#allocation0] sm:$0x1] }
  0x9f   :  { %100 = vst [vmem:[%s208_s1] sm:$0x1] %v97_v31 }

// kernel: tile.17
= control target key start
LH: loop header
LB: loop body
LE: loop exit
PB: predicated region body
PF: predicated region fallthrough
CT: control target
= control target key end

     0   :  { %vm6_vm0 = vcmask 1043458   ;;  %vm10_vm1 = vcmask 1045508   ;;  %vm14_vm2 = vcmask 1047558   ;;  %s24_s6 = smov 3  ;;  %s27_s7 = smov 12  ;;  %vm16_vm3 = vcmask 64512   ;;  %s974_s0 = inlined_call_operand.vmem [shape: f32[9,16,8], index: 0, kind: input, shape index: {}]   ;;  %s975_s1 = inlined_call_operand.vmem [shape: f32[9,128], index: 1, kind: output, shape index: {}]  }
   0x1   :  { %v460_v0 = vld [vmem:[%s974_s0 + $0xf] ss:$16 sm:%s24_s6]   ;;  %s32_s12 = smov 48  ;;  %s37_s13 = smov 192  ;;  %v470_v26 = vld [vmem:[%s974_s0 + $0x8e] sm:$0x1]  }
   0x2   :  { %v461_v1 = vld [vmem:[%s974_s0 + $0xf] ss:$16 sm:%s27_s7]   ;;  %s53_s18 = smov 3  ;;  %s56_s21 = smov 12  ;;  %v476_v32 = vld [vmem:[%s974_s0 + $0x8d] sm:$0x1]  }
   0x3   :  { %v30_v2 = vsel %vm6_vm0, %v461_v1, %v460_v0  ;;  %v462_v3 = vld [vmem:[%s974_s0 + $0xf] ss:$16 sm:%s32_s12]   ;;  %v466_v6 = vld [vmem:[%s974_s0 + $0xe] ss:$16 sm:%s53_s18]   ;;  %s61_s22 = smov 48  ;;  %s66_s27 = smov 192 }
   0x4   :  { %v463_v4 = vld [vmem:[%s974_s0 + $0xf] ss:$16 sm:%s37_s13]   ;;  %v35_v5 = vsel %vm10_vm1, %v462_v3, %v30_v2  ;;  %v467_v8 = vld [vmem:[%s974_s0 + $0xe] ss:$16 sm:%s56_s21]   ;;  %s565_s28 = smov 120   ;;  %s111_s2 = smov 3 }
   0x5   :  { %v40_v7 = vsel %vm14_vm2, %v463_v4, %v35_v5  ;;  %v468_v9 = vld [vmem:[%s974_s0 + $0xe] ss:$16 sm:%s61_s22]   ;;  %v59_v10 = vsel %vm6_vm0, %v467_v8, %v466_v6  ;;  %s114_s3 = smov 12  ;;  %v478_v14 = vld [vmem:[%s974_s0 + $0xc] ss:$16 sm:%s111_s2]   ;;  %s119_s6 = smov 48 }
   0x6   :  { %41 = vrot.lane.b32.xlu0 %v40_v7, %s565_s28  ;;  %v469_v11 = vld [vmem:[%s974_s0 + $0xe] ss:$16 sm:%s66_s27]   ;;  %v64_v12 = vsel %vm10_vm1, %v468_v9, %v59_v10  ;;  %s566_s7 = smov 112   ;;  %v464_v15 = vld [vmem:[%s974_s0 + $0x8f] sm:$0x1]   ;;  %s82_s12 = smov 3 }
   0x7   :  { %v69_v13 = vsel %vm14_vm2, %v469_v11, %v64_v12  ;;  %v479_v16 = vld [vmem:[%s974_s0 + $0xc] ss:$16 sm:%s114_s3]   ;;  %s85_s13 = smov 12  ;;  %v472_v17 = vld [vmem:[%s974_s0 + $0xd] ss:$16 sm:%s82_s12]   ;;  %s90_s18 = smov 48 }
   0x8   :  { %70 = vrot.lane.b32.xlu1 %v69_v13, %s566_s7  ;;  %v473_v18 = vld [vmem:[%s974_s0 + $0xd] ss:$16 sm:%s85_s13]   ;;  %s95_s19 = smov 192  ;;  %v117_v23 = vsel %vm6_vm0, %v479_v16, %v478_v14  ;;  %s124_s26 = smov 192  ;;  %v482_v37 = vld [vmem:[%s974_s0 + $0x8c] sm:$0x1]  }
   0x9   :  { %v88_v19 = vsel %vm6_vm0, %v473_v18, %v472_v17  ;;  %v474_v20 = vld [vmem:[%s974_s0 + $0xd] ss:$16 sm:%s90_s18]   ;;  %v480_v24 = vld [vmem:[%s974_s0 + $0xc] ss:$16 sm:%s119_s6]   ;;  %s567_s29 = smov 104   ;;  %s169_s3 = smov 3 }
   0xa   :  { %v475_v21 = vld [vmem:[%s974_s0 + $0xd] ss:$16 sm:%s95_s19]   ;;  %v93_v22 = vsel %vm10_vm1, %v474_v20, %v88_v19  ;;  %v122_v27 = vsel %vm10_vm1, %v480_v24, %v117_v23  ;;  %v481_v28 = vld [vmem:[%s974_s0 + $0xc] ss:$16 sm:%s124_s26]   ;;  %s140_s4 = smov 3  ;;  %s143_s5 = smov 12 }
   0xb   :  { %v98_v25 = vsel %vm14_vm2, %v475_v21, %v93_v22  ;;  %s172_s6 = smov 12  ;;  %v484_v29 = vld [vmem:[%s974_s0 + $0xb] ss:$16 sm:%s140_s4]   ;;  %s148_s11 = smov 48  ;;  %v127_v31 = vsel %vm14_vm2, %v481_v28, %v122_v27  ;;  %v490_v33 = vld [vmem:[%s974_s0 + $0xa] ss:$16 sm:%s169_s3]  }
   0xc   :  { %99 = vrot.lane.b32.xlu2 %v98_v25, %s567_s29  ;;  %v485_v30 = vld [vmem:[%s974_s0 + $0xb] ss:$16 sm:%s143_s5]   ;;  %s177_s18 = smov 48  ;;  %s153_s21 = smov 192  ;;  %v494_v56 = vld [vmem:[%s974_s0 + $0x8a] sm:$0x1]  }
   0xd   :  { %v491_v34 = vld [vmem:[%s974_s0 + $0xa] ss:$16 sm:%s172_s6]   ;;  %v146_v35 = vsel %vm6_vm0, %v485_v30, %v484_v29  ;;  %v486_v36 = vld [vmem:[%s974_s0 + $0xb] ss:$16 sm:%s148_s11]   ;;  %s568_s22 = smov 96   ;;  %s198_s25 = smov 3 }
   0xe   :  { %47 = vrot.lane.b32.xlu0 %v464_v15, %s565_s28  ;;  %s201_s26 = smov 12  ;;  %v175_v38 = vsel %vm6_vm0, %v491_v34, %v490_v33  ;;  %v492_v39 = vld [vmem:[%s974_s0 + $0xa] ss:$16 sm:%s177_s18]   ;;  %v151_v40 = vsel %vm10_vm1, %v486_v36, %v146_v35  ;;  %v488_v44 = vld [vmem:[%s974_s0 + $0x8b] sm:$0x1]   ;;  %s211_s14 = smov 192 }
   0xf   :  { %v487_v41 = vld [vmem:[%s974_s0 + $0xb] ss:$16 sm:%s153_s21]   ;;  %v496_v42 = vld [vmem:[%s974_s0 + $0x9] ss:$16 sm:%s198_s25]   ;;  %v180_v45 = vsel %vm10_vm1, %v492_v39, %v175_v38  ;;  %s569_s15 = smov 88   ;;  %s227_s16 = smov 3 }
  0x10   :  { %76 = vrot.lane.b32.xlu1 %v470_v26, %s566_s7  ;;  %v497_v43 = vld [vmem:[%s974_s0 + $0x9] ss:$16 sm:%s201_s26]   ;;  %s206_s7 = smov 48  ;;  %v156_v47 = vsel %vm14_vm2, %v487_v41, %v151_v40  ;;  %s230_s17 = smov 12  ;;  %v506_v4 = vld [vmem:[%s974_s0 + $0x88] sm:$0x1]  }
  0x11   :  { %v204_v48 = vsel %vm6_vm0, %v497_v43, %v496_v42  ;;  %v498_v49 = vld [vmem:[%s974_s0 + $0x9] ss:$16 sm:%s206_s7]   ;;  %s570_s20 = smov 80   ;;  %s256_s21 = smov 3  ;;  %v502_v53 = vld [vmem:[%s974_s0 + $0x8] ss:$16 sm:%s227_s16]  }
  0x12   :  { %v209_v51 = vsel %vm10_vm1, %v498_v49, %v204_v48  ;;  %v499_v52 = vld [vmem:[%s974_s0 + $0x9] ss:$16 sm:%s211_s14]   ;;  %v503_v54 = vld [vmem:[%s974_s0 + $0x8] ss:$16 sm:%s230_s17]   ;;  %s235_s27 = smov 48  ;;  %s264_s5 = smov 48 }
  0x13   :  { %v214_v55 = vsel %vm14_vm2, %v499_v52, %v209_v51  ;;  %v508_v57 = vld [vmem:[%s974_s0 + $0x7] ss:$16 sm:%s256_s21]   ;;  %v233_v59 = vsel %vm6_vm0, %v503_v54, %v502_v53  ;;  %v504_v60 = vld [vmem:[%s974_s0 + $0x8] ss:$16 sm:%s235_s27]   ;;  %s240_s8 = smov 192  ;;  %s571_s9 = smov 72  }
  0x14   :  { %105 = vrot.lane.b32.xlu2 %v476_v32, %s567_s29  ;;  %s182_s29 = smov 192  ;;  %v500_v61 = vld [vmem:[%s974_s0 + $0x89] sm:$0x1]   ;;  %s285_s12 = smov 3  ;;  %v510_v63 = vld [vmem:[%s974_s0 + $0x7] ss:$16 sm:%s264_s5]   ;;  %v238_v0 = vsel %vm10_vm1, %v504_v60, %v233_v59 }
  0x15   :  { %v493_v46 = vld [vmem:[%s974_s0 + $0xa] ss:$16 sm:%s182_s29]   ;;  %s288_s13 = smov 12  ;;  %s269_s16 = smov 192  ;;  %v505_v1 = vld [vmem:[%s974_s0 + $0x8] ss:$16 sm:%s240_s8]  }
  0x16   :  { %128 = vrot.lane.b32.xlu0 %v127_v31, %s568_s22  ;;  %v185_v50 = vsel %vm14_vm2, %v493_v46, %v180_v45  ;;  %v514_v2 = vld [vmem:[%s974_s0 + $0x6] ss:$16 sm:%s285_s12]   ;;  %s293_s23 = smov 48  ;;  %v243_v7 = vsel %vm14_vm2, %v505_v1, %v238_v0  ;;  %s298_s30 = smov 192  ;;  %v512_v16 = vld [vmem:[%s974_s0 + $0x87] sm:$0x1]  }
  0x17   :  { %v515_v3 = vld [vmem:[%s974_s0 + $0x6] ss:$16 sm:%s288_s13]   ;;  %v511_v6 = vld [vmem:[%s974_s0 + $0x7] ss:$16 sm:%s269_s16]   ;;  %s572_s2 = smov 64   ;;  %s314_s3 = smov 3 }
  0x18   :  { %134 = vrot.lane.b32.xlu1 %v482_v37, %s568_s22  ;;  %s259_s22 = smov 12  ;;  %v291_v8 = vsel %vm6_vm0, %v515_v3, %v514_v2  ;;  %v516_v9 = vld [vmem:[%s974_s0 + $0x6] ss:$16 sm:%s293_s23]   ;;  %s317_s4 = smov 12  ;;  %v524_v28 = vld [vmem:[%s974_s0 + $0x85] sm:$0x1]  }
  0x19   :  { %v509_v58 = vld [vmem:[%s974_s0 + $0x7] ss:$16 sm:%s259_s22]   ;;  %v296_v11 = vsel %vm10_vm1, %v516_v9, %v291_v8  ;;  %v517_v12 = vld [vmem:[%s974_s0 + $0x6] ss:$16 sm:%s298_s30]   ;;  %s573_s7 = smov 56   ;;  %s343_s8 = smov 3 }
  0x1a   :  { %v262_v62 = vsel %vm6_vm0, %v509_v58, %v508_v57  ;;  %v520_v13 = vld [vmem:[%s974_s0 + $0x5] ss:$16 sm:%s314_s3]   ;;  %s322_s14 = smov 48  ;;  %v301_v15 = vsel %vm14_vm2, %v517_v12, %v296_v11  ;;  %v526_v17 = vld [vmem:[%s974_s0 + $0x4] ss:$16 sm:%s343_s8]   ;;  %s351_s21 = smov 48 }
  0x1b   :  { %v267_v5 = vsel %vm10_vm1, %v510_v63, %v262_v62  ;;  %v521_v14 = vld [vmem:[%s974_s0 + $0x5] ss:$16 sm:%s317_s4]   ;;  %s327_s24 = smov 192  ;;  %s574_s25 = smov 48   ;;  %v518_v21 = vld [vmem:[%s974_s0 + $0x86] sm:$0x1]  }
  0x1c   :  { %157 = vrot.lane.b32.xlu2 %v156_v47, %s569_s15  ;;  %v272_v10 = vsel %vm14_vm2, %v511_v6, %v267_v5  ;;  %v320_v19 = vsel %vm6_vm0, %v521_v14, %v520_v13  ;;  %v522_v20 = vld [vmem:[%s974_s0 + $0x5] ss:$16 sm:%s322_s14]   ;;  %s372_s28 = smov 3  ;;  %s375_s29 = smov 12  ;;  %v530_v40 = vld [vmem:[%s974_s0 + $0x84] sm:$0x1]  }
  0x1d   :  { %v528_v23 = vld [vmem:[%s974_s0 + $0x4] ss:$16 sm:%s351_s21]   ;;  %s356_s3 = smov 192  ;;  %v325_v24 = vsel %vm10_vm1, %v522_v20, %v320_v19  ;;  %v523_v25 = vld [vmem:[%s974_s0 + $0x5] ss:$16 sm:%s327_s24]   ;;  %s380_s10 = smov 48 }
  0x1e   :  { %163 = vrot.lane.b32.xlu0 %v488_v44, %s569_s15  ;;  %v532_v26 = vld [vmem:[%s974_s0 + $0x3] ss:$16 sm:%s372_s28]   ;;  %v330_v31 = vsel %vm14_vm2, %v523_v25, %v325_v24  ;;  %s385_s17 = smov 192  ;;  %s575_s18 = smov 40   ;;  %v458_v63 = vld [vmem:[%s974_s0 + $0x80] sm:$0x1]  }
  0x1f   :  { %v533_v27 = vld [vmem:[%s974_s0 + $0x3] ss:$16 sm:%s375_s29]   ;;  %v529_v30 = vld [vmem:[%s974_s0 + $0x4] ss:$16 sm:%s356_s3]   ;;  %s401_s19 = smov 3  ;;  %s576_s23 = smov 32  }
  0x20   :  { %186 = vrot.lane.b32.xlu1 %v185_v50, %s570_s20  ;;  %v378_v32 = vsel %vm6_vm0, %v533_v27, %v532_v26  ;;  %v534_v33 = vld [vmem:[%s974_s0 + $0x3] ss:$16 sm:%s380_s10]   ;;  %s430_s24 = smov 3  ;;  %s409_s30 = smov 48  ;;  %v542_v50 = vld [vmem:[%s974_s0 + $0x82] sm:$0x1]  }
  0x21   :  { %v383_v35 = vsel %vm10_vm1, %v534_v33, %v378_v32  ;;  %v535_v36 = vld [vmem:[%s974_s0 + $0x3] ss:$16 sm:%s385_s17]   ;;  %v538_v37 = vld [vmem:[%s974_s0 + $0x2] ss:$16 sm:%s401_s19]   ;;  %s438_s8 = smov 48  ;;  %s414_s11 = smov 192 }
  0x22   :  { %v388_v39 = vsel %vm14_vm2, %v535_v36, %v383_v35  ;;  %v544_v41 = vld [vmem:[%s974_s0 + $0x1] ss:$16 sm:%s430_s24]   ;;  %v540_v44 = vld [vmem:[%s974_s0 + $0x2] ss:$16 sm:%s409_s30]   ;;  %s577_s12 = smov 24   ;;  %s443_s17 = smov 192 }
  0x23   :  { %v536_v45 = vld [vmem:[%s974_s0 + $0x83] sm:$0x1]   ;;  %v546_v47 = vld [vmem:[%s974_s0 + $0x1] ss:$16 sm:%s438_s8]   ;;  %s578_s24 = smov 16   ;;  %s2_s28 = smov 3 }
  0x24   :  { %192 = vrot.lane.b32.xlu2 %v494_v56, %s570_s20  ;;  %s404_s20 = smov 12  ;;  %v541_v49 = vld [vmem:[%s974_s0 + $0x2] ss:$16 sm:%s414_s11]   ;;  %s4_s29 = smov 12  ;;  %459 = vst.msk [vmem:[%s975_s1 + $0x8] sm:$0x1] %vm16_vm3, %v458_v63  }
  0x25   :  { %v539_v38 = vld [vmem:[%s974_s0 + $0x2] ss:$16 sm:%s404_s20]   ;;  %v547_v52 = vld [vmem:[%s974_s0 + $0x1] ss:$16 sm:%s443_s17]   ;;  %s8_s30 = smov 48  ;;  %vm43_vm4 = vcmask 1048512  }
  0x26   :  { %215 = vrot.lane.b32.xlu0 %v214_v55, %s571_s9  ;;  %v407_v43 = vsel %vm6_vm0, %v539_v38, %v538_v37  ;;  %v548_v55 = vld [vmem:[%s974_s0 + $0x81] sm:$0x1]   ;;  %v3_v56 = vld [vmem:[%s974_s0] ss:$16 sm:%s2_s28]   ;;  %vm72_vm5 = vcmask 982912   ;;  %vm101_vm6 = vcmask 917312  }
  0x27   :  { %v412_v48 = vsel %vm10_vm1, %v540_v44, %v407_v43  ;;  %v5_v57 = vld [vmem:[%s974_s0] ss:$16 sm:%s4_s29]   ;;  %vm130_vm7 = vcmask 851712   ;;  %vm159_vm8 = vcmask 786112   ;;  %vm188_vm9 = vcmask 720512  }
  0x28   :  { %221 = vrot.lane.b32.xlu1 %v500_v61, %s571_s9  ;;  %s346_s9 = smov 12  ;;  %v417_v53 = vsel %vm14_vm2, %v541_v49, %v412_v48  ;;  %v9_v58 = vld [vmem:[%s974_s0] ss:$16 sm:%s8_s30]   ;;  %v7_v59 = vsel %vm6_vm0, %v5_v57, %v3_v56  ;;  %vm217_vm10 = vcmask 654912   ;;  %vm246_vm11 = vcmask 589312  }
  0x29   :  { %v527_v18 = vld [vmem:[%s974_s0 + $0x4] ss:$16 sm:%s346_s9]   ;;  %v11_v61 = vsel %vm10_vm1, %v9_v58, %v7_v59  ;;  %vm275_vm12 = vcmask 523712   ;;  %vm304_vm13 = vcmask 458112   ;;  %vm333_vm14 = vcmask 392512  }
  0x2a   :  { %v349_v22 = vsel %vm6_vm0, %v527_v18, %v526_v17  ;;  %vm362_vm15 = vcmask 326912  }
  0x2b   :  { %v354_v29 = vsel %vm10_vm1, %v528_v23, %v349_v22 }
  0x2c   :  { %244 = vrot.lane.b32.xlu2 %v243_v7, %s572_s2  ;;  %v359_v34 = vsel %vm14_vm2, %v529_v30, %v354_v29 }
  0x2e   :  { %250 = vrot.lane.b32.xlu0 %v506_v4, %s572_s2  ;;  %s12_s2 = smov 192 }
  0x2f   :  { %v13_v60 = vld [vmem:[%s974_s0] ss:$16 sm:%s12_s2]  }
  0x30   :  { %273 = vrot.lane.b32.xlu1 %v272_v10, %s573_s7  ;;  %v15_v62 = vsel %vm14_vm2, %v13_v60, %v11_v61 }
  0x31   :  { %17 = vst.msk [vmem:[%s975_s1] sm:$0xff] %vm16_vm3, %v15_v62  }
  0x34   :  { %279 = vrot.lane.b32.xlu2 %v512_v16, %s573_s7 }
  0x36   :  { %302 = vrot.lane.b32.xlu0 %v301_v15, %s574_s25 }
  0x38   :  { %308 = vrot.lane.b32.xlu1 %v518_v21, %s574_s25  ;;  %s433_s25 = smov 12 }
  0x39   :  { %v545_v42 = vld [vmem:[%s974_s0 + $0x1] ss:$16 sm:%s433_s25]   ;;  %s579_s25 = smov 8  }
  0x3a   :  { %v436_v46 = vsel %vm6_vm0, %v545_v42, %v544_v41  ;;  %vm391_vm0 = vcmask 261312  }
  0x3b   :  { %v441_v51 = vsel %vm10_vm1, %v546_v47, %v436_v46  ;;  %vm420_vm1 = vcmask 195712  }
  0x3c   :  { %331 = vrot.lane.b32.xlu2 %v330_v31, %s575_s18  ;;  %v446_v54 = vsel %vm14_vm2, %v547_v52, %v441_v51  ;;  %vm449_vm2 = vcmask 130112  }
  0x3e   :  { %337 = vrot.lane.b32.xlu0 %v524_v28, %s575_s18 }
  0x40   :  { %360 = vrot.lane.b32.xlu1 %v359_v34, %s576_s23 }
  0x44   :  { %366 = vrot.lane.b32.xlu2 %v530_v40, %s576_s23 }
  0x46   :  { %389 = vrot.lane.b32.xlu0 %v388_v39, %s577_s12 }
  0x48   :  { %395 = vrot.lane.b32.xlu1 %v536_v45, %s577_s12 }
  0x4c   :  { %418 = vrot.lane.b32.xlu2 %v417_v53, %s578_s24 }
  0x4e   :  { %424 = vrot.lane.b32.xlu0 %v542_v50, %s578_s24 }
  0x50   :  { %447 = vrot.lane.b32.xlu1 %v446_v54, %s579_s25 }
  0x54   :  { %453 = vrot.lane.b32.xlu2 %v548_v55, %s579_s25 }
  0x66   :  { %v100_v0 = vpop.permute.xlu2 %99  }
  0x6e   :  { %v106_v1 = vpop.permute.xlu2 %105  }
  0x76   :  { %v158_v3 = vpop.permute.xlu2 %157  }
  0x78   :  { %v42_v2 = vpop.permute.xlu0 %41  }
  0x79   :  { %44 = vst.msk [vmem:[%s975_s1] sm:$0xff] %vm43_vm4, %v42_v2  }
  0x7a   :  { %v71_v4 = vpop.permute.xlu1 %70  }
  0x7b   :  { %73 = vst.msk [vmem:[%s975_s1] sm:$0xff] %vm72_vm5, %v71_v4  }
  0x7c   :  { %102 = vst.msk [vmem:[%s975_s1] sm:$0xff] %vm101_vm6, %v100_v0  }
  0x7e   :  { %v193_v6 = vpop.permute.xlu2 %192  }
  0x80   :  { %v48_v5 = vpop.permute.xlu0 %47  }
  0x81   :  { %465 = vst.msk [vmem:[%s975_s1 + $0x8] sm:$0x1] %vm43_vm4, %v48_v5  }
  0x82   :  { %v77_v7 = vpop.permute.xlu1 %76  }
  0x83   :  { %471 = vst.msk [vmem:[%s975_s1 + $0x8] sm:$0x1] %vm72_vm5, %v77_v7  }
  0x84   :  { %477 = vst.msk [vmem:[%s975_s1 + $0x8] sm:$0x1] %vm101_vm6, %v106_v1  }
  0x86   :  { %v245_v9 = vpop.permute.xlu2 %244  }
  0x88   :  { %v129_v8 = vpop.permute.xlu0 %128  }
  0x89   :  { %131 = vst.msk [vmem:[%s975_s1] sm:$0xff] %vm130_vm7, %v129_v8  }
  0x8a   :  { %160 = vst.msk [vmem:[%s975_s1] sm:$0xff] %vm159_vm8, %v158_v3   ;;  %v135_v10 = vpop.permute.xlu1 %134  }
  0x8b   :  { %483 = vst.msk [vmem:[%s975_s1 + $0x8] sm:$0x1] %vm130_vm7, %v135_v10  }
  0x8e   :  { %v280_v12 = vpop.permute.xlu2 %279  }
  0x90   :  { %v164_v11 = vpop.permute.xlu0 %163  }
  0x91   :  { %489 = vst.msk [vmem:[%s975_s1 + $0x8] sm:$0x1] %vm159_vm8, %v164_v11  }
  0x92   :  { %495 = vst.msk [vmem:[%s975_s1 + $0x8] sm:$0x1] %vm188_vm9, %v193_v6   ;;  %v187_v13 = vpop.permute.xlu1 %186  }
  0x93   :  { %189 = vst.msk [vmem:[%s975_s1] sm:$0xff] %vm188_vm9, %v187_v13  }
  0x96   :  { %v332_v15 = vpop.permute.xlu2 %331  }
  0x98   :  { %v216_v14 = vpop.permute.xlu0 %215  }
  0x99   :  { %218 = vst.msk [vmem:[%s975_s1] sm:$0xff] %vm217_vm10, %v216_v14  }
  0x9a   :  { %247 = vst.msk [vmem:[%s975_s1] sm:$0xff] %vm246_vm11, %v245_v9   ;;  %v222_v16 = vpop.permute.xlu1 %221  }
  0x9b   :  { %501 = vst.msk [vmem:[%s975_s1 + $0x8] sm:$0x1] %vm217_vm10, %v222_v16  }
  0x9e   :  { %v367_v18 = vpop.permute.xlu2 %366  }
  0xa0   :  { %v251_v17 = vpop.permute.xlu0 %250  }
  0xa1   :  { %507 = vst.msk [vmem:[%s975_s1 + $0x8] sm:$0x1] %vm246_vm11, %v251_v17  }
  0xa2   :  { %513 = vst.msk [vmem:[%s975_s1 + $0x8] sm:$0x1] %vm275_vm12, %v280_v12   ;;  %v274_v19 = vpop.permute.xlu1 %273  }
  0xa3   :  { %276 = vst.msk [vmem:[%s975_s1] sm:$0xff] %vm275_vm12, %v274_v19  }
  0xa6   :  { %v419_v21 = vpop.permute.xlu2 %418  }
  0xa8   :  { %v303_v20 = vpop.permute.xlu0 %302  }
  0xa9   :  { %305 = vst.msk [vmem:[%s975_s1] sm:$0xff] %vm304_vm13, %v303_v20  }
  0xaa   :  { %334 = vst.msk [vmem:[%s975_s1] sm:$0xff] %vm333_vm14, %v332_v15   ;;  %v309_v22 = vpop.permute.xlu1 %308  }
  0xab   :  { %519 = vst.msk [vmem:[%s975_s1 + $0x8] sm:$0x1] %vm304_vm13, %v309_v22  }
  0xae   :  { %v454_v24 = vpop.permute.xlu2 %453  }
  0xb0   :  { %v338_v23 = vpop.permute.xlu0 %337  }
  0xb1   :  { %525 = vst.msk [vmem:[%s975_s1 + $0x8] sm:$0x1] %vm333_vm14, %v338_v23  }
  0xb2   :  { %531 = vst.msk [vmem:[%s975_s1 + $0x8] sm:$0x1] %vm362_vm15, %v367_v18   ;;  %v361_v25 = vpop.permute.xlu1 %360  }
  0xb3   :  { %363 = vst.msk [vmem:[%s975_s1] sm:$0xff] %vm362_vm15, %v361_v25  }
  0xb8   :  { %v390_v26 = vpop.permute.xlu0 %389  }
  0xb9   :  { %392 = vst.msk [vmem:[%s975_s1] sm:$0xff] %vm391_vm0, %v390_v26  }
  0xba   :  { %421 = vst.msk [vmem:[%s975_s1] sm:$0xff] %vm420_vm1, %v419_v21   ;;  %v396_v27 = vpop.permute.xlu1 %395  }
  0xbb   :  { %537 = vst.msk [vmem:[%s975_s1 + $0x8] sm:$0x1] %vm391_vm0, %v396_v27  }
  0xc0   :  { %v425_v28 = vpop.permute.xlu0 %424  }
  0xc1   :  { %543 = vst.msk [vmem:[%s975_s1 + $0x8] sm:$0x1] %vm420_vm1, %v425_v28  }
  0xc2   :  { %549 = vst.msk [vmem:[%s975_s1 + $0x8] sm:$0x1] %vm449_vm2, %v454_v24   ;;  %v448_v29 = vpop.permute.xlu1 %447  }
  0xc3   :  { %450 = vst.msk [vmem:[%s975_s1] sm:$0xff] %vm449_vm2, %v448_v29  }

// kernel: sepconv_forward.1
= control target key start
LH: loop header
LB: loop body
LE: loop exit
PB: predicated region body
PF: predicated region fallthrough
CT: control target
= control target key end

     0   :  { %s1160_s15 = smov 0   ;;  %s1626_s0 = inlined_call_operand.vmem [shape: f32[2,16,128], index: 0, kind: input, shape index: {}]   ;;  %s1627_s1 = inlined_call_operand.vmem [shape: f32[9,128], index: 1, kind: input, shape index: {}]   ;;  %s1628_s2 = inlined_call_operand.vmem [shape: f32[15,128], index: 2, kind: input, shape index: {}]   ;;  %s1629_s3 = inlined_call_operand.vmem [shape: f32[2,128], index: 3, kind: input, shape index: {}]   ;;  %s1630_s4 = inlined_call_operand.vmem [shape: f32[2,16,128], index: 4, kind: output, shape index: {}]  }
   0x1 LB: > { %s1018_s16 = sadd.s32 4294967295, %s1102_s15   ;;  %p1022_p0 = scmp.ge.s32.totalorder %s1102_s15, 1  ;;  %s1102_s15 = sphi %s1160_s15, %s14_s15  }
   0x2   : > { %p162_p1 = scmp.lt.s32.totalorder %s1102_s15, 3 }
   0x4   : > { %p163_p2 = pnand %p1022_p0, %p162_p1 }
   0x5   : > { %p188_p3 = scmp.lt.s32.totalorder (!%p163_p2), %s1018_s16, 1  ;;  %s1104_s19 = smov (!%p163_p2), 8  }
   0x6   : > { %166 = sbr.rel (%p163_p2) target bundleno = 712 (0x2c8), region = 36  ;;  %s1105_s26 = smov (!%p163_p2), 16  }
   0x7   : > { %s1106_s11 = smov (!%p163_p2), 1   ;;  %s1107_s22 = smov (!%p163_p2), 4  }
   0x8   : > { %s1108_s23 = smov (!%p163_p2), 3   ;;  %s1109_s24 = smov (!%p163_p2), 2  }
   0x9   : > { %s1110_s5 = smov (!%p163_p2), 7   ;;  %s1111_s6 = smov (!%p163_p2), 6  }
   0xa   : > { %s1112_s7 = smov (!%p163_p2), 5   ;;  %s1113_s18 = smov (!%p163_p2), 9  }
   0xb   : > { %v1070_v0 = vld [vmem:[%s1627_s1 + $0x1] ss:$0 sm:$0xff]  ;;  %s1632_s16 = smov (!%p188_p3, %s1018_s16), 1  ;;  %v1074_v1 = vld [vmem:[%s1627_s1 + $0x2] ss:$0 sm:$0xff]  ;;  %vm215_vm0 = vcmask 1040384  }
   0xc   : > { %253 = vrot.lane.b32.xlu1 %v1070_v0, %s1104_s19  ;;  %s1029_s20 = sshll.u32 %s1632_s16, 4  ;;  %282 = vrot.lane.b32.xlu2 %v1074_v1, %s1105_s26  ;;  %v1075_v6 = vld [vmem:[%s1627_s1 + $0x7] ss:$0 sm:$0xff]  ;;  %v1071_v8 = vld [vmem:[%s1627_s1 + $0x4] ss:$0 sm:$0xff]  ;;  %vm199_vm1 = vcmask 130048  }
   0xd   : > { %s192_s25 = scalar_lea.vmem %s1626_s0, %s1029_s20  ;;  %v1076_v9 = vld [vmem:[%s1628_s2 + $0x1] ss:$0 sm:$0xff]  ;;  %v1072_v10 = vld [vmem:[%s1627_s1 + $0x5] ss:$0 sm:$0xff]  ;;  %v1073_v11 = vld [vmem:[%s1627_s1 + $0x8] ss:$0 sm:$0xff]  ;;  %s197_s12 = scalar_lea.vmem %s1630_s4, %s1029_s20 }
   0xe   : > { %v211_v2 = vld [vmem:[%s192_s25] sm:$0xff]  ;;  %v212_v3 = vld [vmem:[%s192_s25 + $0x8] sm:$0xff]  ;;  %s1114_s21 = smov 11   ;;  %v1115_v22 = vmov 0.0   ;;  %vm204_vm2 = vcmask 123904   ;;  %s1117_s28 = smov 12  }
   0xf   : > { %v216_v4 = vrot.slane %v211_v2, 7  ;;  %v217_v5 = vrot.slane %v212_v3, 7  ;;  %v1078_v12 = vld [vmem:[%s1628_s2 + $0x4] ss:$0 sm:$0xff]  ;;  %v1080_v13 = vld [vmem:[%s1628_s2 + $0x3] ss:$0 sm:$0xff] }
  0x10   : > { %v1077_v14 = vld [vmem:[%s1628_s2 + $0x2] ss:$0 sm:$0xff]  ;;  %v1081_v15 = vld [vmem:[%s1628_s2 + $0x7] ss:$0 sm:$0xff]  ;;  %v1083_v16 = vld [vmem:[%s1628_s2 + $0x6] ss:$0 sm:$0xff] }
  0x11   : > { %219 = vrot.lane.b32.xlu0 %v216_v4, %s1104_s19  ;;  %v218_v7 = vsel %vm215_vm0, %v216_v4, %v217_v5  ;;  %v1079_v17 = vld [vmem:[%s1628_s2 + $0x5] ss:$0 sm:$0xff]  ;;  %v1082_v18 = vld [vmem:[%s1628_s2 + $0x8] ss:$0 sm:$0xff]  ;;  %v1084_v19 = vld [vmem:[%s1628_s2 + $0x9] ss:$0 sm:$0xff] }
  0x12   : > { %v1085_v20 = vld [vmem:[%s1628_s2 + $0xb] ss:$0 sm:$0xff]  ;;  %v1086_v21 = vld [vmem:[%s1628_s2 + $0xa] ss:$0 sm:$0xff]  ;;  %198 = vst [vmem:[#allocation2] sm:$0xff] %v1115_v22  ;;  %s1118_s29 = smov 14  }
  0x13   : > { %200 = vst.msk [vmem:[#allocation2 + $0x8] sm:$0xff] %vm199_vm1, %v1115_v22  ;;  %v1087_v23 = vld [vmem:[%s1628_s2 + $0xc] ss:$0 sm:$0xff]  ;;  %v1088_v24 = vld [vmem:[%s1628_s2 + $0xe] ss:$0 sm:$0xff]  ;;  %s1119_s30 = smov 13  }
  0x14   : > { %223 = vrot.lane.b32.xlu1 %v217_v5, %s1104_s19  ;;  %439 = vrot.lane.b32.xlu2 %v1075_v6, %s1104_s19  ;;  %201 = vst [vmem:[#allocation2 + $0x10] sm:$0xff] %v1115_v22  ;;  %v1089_v25 = vld [vmem:[%s1628_s2 + $0xd] ss:$0 sm:$0xff]  ;;  %vm228_vm3 = vcmask 1047617   ;;  %vm230_vm4 = vcmask 64513   ;;  %vm236_vm5 = vcmask 1040448  }
  0x15   : > { %202 = vst.msk [vmem:[#allocation2 + $0x18] sm:$0xff] %vm199_vm1, %v1115_v22  ;;  %vm238_vm6 = vcmask 57344   ;;  %vm232_vm7 = vcmask 1047616   ;;  %vm234_vm8 = vcmask 64512   ;;  %v1091_v46 = vld [vmem:[%s1627_s1 + $0x3] ss:$0 sm:$0xff] }
  0x16   : > { %203 = vst [vmem:[#allocation2 + $0x20] sm:$0x3] %v1115_v22  ;;  %v1092_v47 = vld [vmem:[%s1627_s1 + $0x6] ss:$0 sm:$0xff]  ;;  %vm318_vm9 = vcmask 1046528   ;;  %vm424_vm10 = vcmask 1045504  }
  0x17   : > { %206 = vst [vmem:[#allocation3] sm:$0xff] %v1115_v22  ;;  %vm272_vm11 = vcmask 982016   ;;  %vm301_vm12 = vcmask 916480   ;;  %vm207_vm13 = vcmask 113664   ;;  %vm536_vm14 = vcmask 1047608   ;;  %s1129_s25 = smov 118  }
  0x18   : > { %209 = vst [vmem:[#allocation3 + $0x10] sm:$0xff] %v1115_v22  ;;  %vm538_vm15 = vcmask 56320   ;;  %s1131_s27 = smov 117   ;;  %vm574_vm0 = vcmask 1039360   ;;  %vm603_vm1 = vcmask 1031168  }
  0x19   : > { %221 = vrot.lane.b32.xlu0 %v218_v7, %s1104_s19  ;;  %205 = vst.msk [vmem:[#allocation2 + $0x28] sm:$0x3] %vm204_vm2, %v1115_v22  ;;  %vm632_vm2 = vcmask 1022976  }
  0x1a   : > { %210 = vst.msk [vmem:[#allocation3 + $0x18] sm:$0xff] %vm207_vm13, %v1115_v22 }
  0x1b   : > { %208 = vst.msk [vmem:[#allocation3 + $0x8] sm:$0xff] %vm207_vm13, %v1115_v22  ;;  %vm950_vm13 = vcmask 932864  }
  0x1c   : > { %333 = vrot.lane.b32.xlu1 %v1071_v8, %s1104_s19  ;;  %555 = vrot.lane.b32.xlu2 %v1076_v9, %s1106_s11 }
  0x21   : > { %375 = vrot.lane.b32.xlu0 %v1072_v10, %s1105_s26 }
  0x24   : > { %481 = vrot.lane.b32.xlu1 %v1073_v11, %s1105_s26  ;;  %642 = vrot.lane.b32.xlu2 %v1078_v12, %s1107_s22  ;;  %s1126_s22 = smov 124   ;;  %s1130_s26 = smov 119  }
  0x29   : > { %613 = vrot.lane.b32.xlu0 %v1080_v13, %s1108_s23  ;;  %s1127_s23 = smov 122  }
  0x2c   : > { %584 = vrot.lane.b32.xlu1 %v1077_v14, %s1109_s24  ;;  %729 = vrot.lane.b32.xlu2 %v1081_v15, %s1110_s5  ;;  %s1128_s24 = smov 121  }
  0x31   : > { %700 = vrot.lane.b32.xlu0 %v1083_v16, %s1111_s6  ;;  %s1120_s6 = smov 120  }
  0x34   : > { %671 = vrot.lane.b32.xlu1 %v1079_v17, %s1112_s7  ;;  %786 = vrot.lane.b32.xlu2 %v1084_v19, %s1113_s18  ;;  %s1121_s7 = smov 112   ;;  %s1123_s18 = smov 127  }
  0x3c   : > { %758 = vrot.lane.b32.xlu1 %v1082_v18, %s1104_s19  ;;  %s1116_s19 = smov 10   ;;  %873 = vrot.lane.b32.xlu2 %v1087_v23, %s1117_s28  ;;  %s1132_s28 = smov 115  }
  0x3d   : > { %815 = vrot.lane.b32.xlu0 %v1086_v21, %s1116_s19  ;;  %s1125_s19 = smov 123  }
  0x44   : > { %844 = vrot.lane.b32.xlu1 %v1085_v20, %s1114_s21  ;;  %s1124_s21 = smov 125  }
  0x45   : > { %902 = vrot.lane.b32.xlu0 %v1089_v25, %s1119_s30  ;;  %s1134_s30 = smov 114  }
  0x4c   : > { %931 = vrot.lane.b32.xlu1 %v1088_v24, %s1118_s29  ;;  %s1133_s29 = smov 116  }
  0x66   : > { %v283_v29 = vpop.permute.xlu2 %282 }
  0x7e   : > { %v254_v26 = vpop.permute.xlu1 %253 }
  0x83   : > { %v220_v27 = vpop.permute.xlu0 %219 }
  0x84   : > { %229 = vst.msk [vmem:[#allocation2] sm:$0xfe] %vm228_vm3, %v220_v27  ;;  %vm661_vm3 = vcmask 1014784  }
  0x85   : > { %231 = vst.msk [vmem:[#allocation2 + $0x8] sm:$0xfe] %vm230_vm4, %v220_v27  ;;  %vm690_vm4 = vcmask 1006592  }
  0x86   : > { %v224_v28 = vpop.permute.xlu1 %223 }
  0x87   : > { %237 = vst.msk [vmem:[#allocation2 + $0x20] sm:$0x1] %vm236_vm5, %v224_v28  ;;  %vm719_vm5 = vcmask 998400  }
  0x88   : > { %239 = vst.msk [vmem:[#allocation2 + $0x28] sm:$0x1] %vm238_vm6, %v224_v28  ;;  %vm748_vm6 = vcmask 990208  }
  0x8b   : > { %v222_v30 = vpop.permute.xlu0 %221  ;;  %v1252_v31 = vld [vmem:[#allocation2] sm:$0xff] }
  0x8c   : > { %233 = vst.msk [vmem:[#allocation2 + $0x10] sm:$0xff] %vm232_vm7, %v222_v30  ;;  %v248_v32 = vld [vmem:[#allocation2 + $0x8] sm:$0xff]  ;;  %v256_v33 = vmul.f32 %v254_v26, %v1252_v31  ;;  %v285_v34 = vmul.f32 %v283_v29, %v1252_v31  ;;  %v308_v50 = vld [vmem:[#allocation2] sm:$0xfe]  ;;  %vm805_vm7 = vcmask 973824  }
  0x8d   : > { %235 = vst.msk [vmem:[#allocation2 + $0x18] sm:$0xff] %vm234_vm8, %v222_v30  ;;  %v286_v35 = vmul.f32 %v283_v29, %v248_v32  ;;  %v257_v38 = vmul.f32 %v254_v26, %v248_v32  ;;  %v1277_v51 = vld [vmem:[#allocation2] sm:$0xfc]  ;;  %v328_v55 = vld [vmem:[#allocation2 + $0x8] sm:$0xfe]  ;;  %v312_v59 = vmul.f32 %v1091_v46, %v308_v50  ;;  %vm834_vm8 = vcmask 965632  }
  0x8e   : > { %264 = vrot.lane.b32.xlu2 %v256_v33, %s1120_s6  ;;  %293 = vrot.lane.b32.xlu0 %v285_v34, %s1121_s7  ;;  %v309_v37 = vld [vmem:[#allocation2 + $0x20] sm:$0x1]  ;;  %v334_v41 = vpop.permute.xlu1 %333  ;;  %v418_v60 = vmul.f32 %v1092_v47, %v1277_v51  ;;  %v440_v33 = vpop.permute.xlu2 %439 }
  0x8f   : > { %295 = vrot.lane.b32.xlu1 %v286_v35, %s1121_s7  ;;  %v340_v44 = vmul.f32 %v334_v41, %v309_v37  ;;  %v1269_v45 = vld [vmem:[#allocation2 + $0x20] sm:$0x3]  ;;  %v314_v56 = vmul.f32 %v1091_v46, %v309_v37  ;;  %v336_v0 = vmul.f32 %v334_v41, %v308_v50  ;;  %v337_v1 = vmul.f32 %v334_v41, %v328_v55  ;;  %v329_v11 = vld [vmem:[#allocation2 + $0x28] sm:$0x1] }
  0x90   : > { %v420_v57 = vmul.f32 %v1092_v47, %v1269_v45  ;;  %v319_v7 = vrot.slane %v312_v59, 1  ;;  %v425_v8 = vrot.slane %v418_v60, 2  ;;  %v341_v23 = vmul.f32 %v334_v41, %v329_v11 }
  0x91   : > { %v354_v49 = vrot.slane %v340_v44, 1  ;;  %v322_v3 = vrot.slane %v314_v56, 1  ;;  %v348_v14 = vrot.slane %v336_v0, 1  ;;  %v351_v15 = vrot.slane %v337_v1, 1 }
  0x92   : > { %v428_v5 = vrot.slane %v420_v57, 2  ;;  %v356_v28 = vrot.slane %v341_v23, 1  ;;  %v446_v57 = vmul.f32 %v440_v33, %v1269_v45 }
  0x93   : > { %v1259_v36 = vld [vmem:[#allocation2 + $0x10] sm:$0xff]  ;;  %v376_v52 = vpop.permute.xlu0 %375 }
  0x94   : > { %v1261_v39 = vld [vmem:[#allocation2 + $0x18] sm:$0xff]  ;;  %v258_v40 = vmul.f32 %v254_v26, %v1259_v36  ;;  %v338_v43 = vmul.f32 %v334_v41, %v1259_v36  ;;  %v287_v53 = vmul.f32 %v283_v29, %v1259_v36  ;;  %v378_v62 = vmul.f32 %v376_v52, %v308_v50 }
  0x95   : > { %v259_v42 = vmul.f32 %v254_v26, %v1261_v39  ;;  %v288_v54 = vmul.f32 %v283_v29, %v1261_v39  ;;  %v339_v58 = vmul.f32 %v334_v41, %v1261_v39  ;;  %v380_v63 = vmul.f32 %v376_v52, %v1259_v36 }
  0x96   : > { %266 = vrot.lane.b32.xlu2 %v257_v38, %s1120_s6  ;;  %268 = vrot.lane.b32.xlu0 %v258_v40, %s1120_s6  ;;  %v349_v48 = vrot.slane %v338_v43, 1  ;;  %v313_v2 = vmul.f32 %v1091_v46, %v1259_v36  ;;  %v419_v4 = vmul.f32 %v1092_v47, %v1259_v36  ;;  %v390_v9 = vrot.slane %v378_v62, 1  ;;  %v434_v40 = vld [vmem:[#allocation2 + $0x8] sm:$0xfc]  ;;  %v482_v50 = vpop.permute.xlu1 %481 }
  0x97   : > { %270 = vrot.lane.b32.xlu1 %v259_v42, %s1120_s6  ;;  %v352_v6 = vrot.slane %v339_v58, 1  ;;  %v391_v10 = vrot.slane %v380_v63, 1  ;;  %v382_v24 = vmul.f32 %v376_v52, %v309_v37  ;;  %v381_v26 = vmul.f32 %v376_v52, %v1261_v39 }
  0x98   : > { %v355_v61 = vsel %vm318_vm9, %v349_v48, %v354_v49  ;;  %v320_v12 = vrot.slane %v313_v2, 1  ;;  %v426_v13 = vrot.slane %v419_v4, 2  ;;  %v350_v20 = vsel %vm318_vm9, %v348_v14, %v349_v48  ;;  %v435_v49 = vld [vmem:[#allocation2 + $0x28] sm:$0x3] }
  0x99   : > { %v353_v21 = vsel %vm318_vm9, %v351_v15, %v352_v6  ;;  %v392_v25 = vsel %vm318_vm9, %v390_v9, %v391_v10  ;;  %v383_v27 = vmul.f32 %v376_v52, %v329_v11  ;;  %v396_v29 = vrot.slane %v382_v24, 1 }
  0x9a   : > { %v1292_v16 = vsel %vm318_vm9, %v320_v12, %v322_v3  ;;  %v1295_v17 = vsel %vm318_vm9, %v319_v7, %v320_v12  ;;  %v1298_v18 = vsel %vm424_vm10, %v425_v8, %v426_v13  ;;  %v1301_v19 = vsel %vm424_vm10, %v426_v13, %v428_v5 }
  0x9b   : > { %v394_v30 = vrot.slane %v381_v26, 1  ;;  %v398_v32 = vrot.slane %v383_v27, 1  ;;  %v357_v34 = vsel %vm318_vm9, %v352_v6, %v356_v28  ;;  %v397_v35 = vsel %vm318_vm9, %v391_v10, %v396_v29 }
  0x9c   : > { %v444_v37 = vmul.f32 %v440_v33, %v1259_v36  ;;  %v379_v38 = vmul.f32 %v376_v52, %v328_v55  ;;  %v445_v42 = vmul.f32 %v440_v33, %v1261_v39  ;;  %v442_v43 = vmul.f32 %v440_v33, %v1277_v51 }
  0x9d   : > { %v399_v41 = vsel %vm318_vm9, %v394_v30, %v398_v32  ;;  %v443_v44 = vmul.f32 %v440_v33, %v434_v40  ;;  %v447_v56 = vmul.f32 %v440_v33, %v435_v49  ;;  %v486_v59 = vmul.f32 %v482_v50, %v1259_v36 }
  0x9e   : > { %297 = vrot.lane.b32.xlu2 %v287_v53, %s1121_s7  ;;  %299 = vrot.lane.b32.xlu0 %v288_v54, %s1121_s7  ;;  %v455_v46 = vrot.slane %v444_v37, 2  ;;  %v393_v47 = vrot.slane %v379_v38, 1  ;;  %v458_v48 = vrot.slane %v445_v42, 2  ;;  %v454_v52 = vrot.slane %v442_v43, 2  ;;  %v1348_v15 = vpop.permute.xlu1 %584 }
  0x9f   : > { %362 = vrot.lane.b32.xlu1 %v355_v61, %s1120_s6  ;;  %v457_v53 = vrot.slane %v443_v44, 2  ;;  %v488_v60 = vmul.f32 %v482_v50, %v1269_v45  ;;  %v1327_v61 = vpop.permute.xlu2 %555  ;;  %v462_v62 = vrot.slane %v447_v56, 2  ;;  %v460_v63 = vrot.slane %v446_v57, 2 }
  0xa0   : > { %v456_v54 = vsel %vm424_vm10, %v454_v52, %v455_v46  ;;  %v395_v55 = vsel %vm318_vm9, %v393_v47, %v394_v30  ;;  %v497_v0 = vrot.slane %v486_v59, 2  ;;  %v485_v2 = vmul.f32 %v482_v50, %v434_v40 }
  0xa1   : > { %v459_v58 = vsel %vm424_vm10, %v457_v53, %v458_v48  ;;  %v502_v1 = vrot.slane %v488_v60, 2  ;;  %v463_v3 = vsel %vm424_vm10, %v458_v48, %v462_v62  ;;  %v461_v4 = vsel %vm424_vm10, %v455_v46, %v460_v63 }
  0xa2   : > { %v487_v5 = vmul.f32 %v482_v50, %v1261_v39  ;;  %v484_v6 = vmul.f32 %v482_v50, %v1277_v51  ;;  %v499_v8 = vrot.slane %v485_v2, 2  ;;  %v489_v39 = vmul.f32 %v482_v50, %v435_v49 }
  0xa3   : > { %v503_v45 = vsel %vm424_vm10, %v497_v0, %v502_v1  ;;  %vm863_vm9 = vcmask 957440  }
  0xa4   : > { %v500_v9 = vrot.slane %v487_v5, 2  ;;  %v496_v10 = vrot.slane %v484_v6, 2  ;;  %v504_v51 = vrot.slane %v489_v39, 2 }
  0xa6   : > { %358 = vrot.lane.b32.xlu2 %v350_v20, %s1120_s6  ;;  %360 = vrot.lane.b32.xlu0 %v353_v21, %s1120_s6  ;;  %v501_v11 = vsel %vm424_vm10, %v499_v8, %v500_v9  ;;  %v498_v12 = vsel %vm424_vm10, %v496_v10, %v497_v0  ;;  %v505_v14 = vsel %vm424_vm10, %v500_v9, %v504_v51  ;;  %v1352_v21 = vpop.permute.xlu0 %613  ;;  %v1354_v23 = vpop.permute.xlu1 %671  ;;  %vm892_vm10 = vcmask 949248  }
  0xa7   : > { %400 = vrot.lane.b32.xlu1 %v392_v25, %s1121_s7  ;;  %v1338_v7 = vpop.permute.xlu2 %642 }
  0xae   : > { %364 = vrot.lane.b32.xlu2 %v357_v34, %s1120_s6  ;;  %404 = vrot.lane.b32.xlu0 %v397_v35, %s1121_s7  ;;  %v1358_v25 = vpop.permute.xlu0 %700  ;;  %v1360_v26 = vpop.permute.xlu1 %758  ;;  %v1090_v35 = vld [vmem:[%s1627_s1] ss:$0 sm:$0xff] }
  0xaf   : > { %406 = vrot.lane.b32.xlu1 %v399_v41, %s1121_s7  ;;  %v1344_v13 = vpop.permute.xlu2 %729  ;;  %v244_v38 = vmul.f32 %v1090_v35, %v1252_v31  ;;  %v245_v53 = vmul.f32 %v1090_v35, %v1259_v36 }
  0xb6   : > { %464 = vrot.lane.b32.xlu0 %v456_v54, %s1120_s6  ;;  %402 = vrot.lane.b32.xlu2 %v395_v55, %s1121_s7  ;;  %v1362_v28 = vpop.permute.xlu0 %815  ;;  %v1364_v29 = vpop.permute.xlu1 %844 }
  0xb7   : > { %466 = vrot.lane.b32.xlu1 %v459_v58, %s1120_s6  ;;  %v1350_v20 = vpop.permute.xlu2 %786 }
  0xbe   : > { %470 = vrot.lane.b32.xlu0 %v463_v3, %s1120_s6  ;;  %468 = vrot.lane.b32.xlu2 %v461_v4, %s1120_s6  ;;  %v1366_v32 = vpop.permute.xlu0 %902  ;;  %v1368_v33 = vpop.permute.xlu1 %931 }
  0xbf   : > { %510 = vrot.lane.b32.xlu1 %v503_v45, %s1121_s7  ;;  %v1356_v24 = vpop.permute.xlu2 %873 }
  0xc6   : > { %508 = vrot.lane.b32.xlu0 %v501_v11, %s1121_s7  ;;  %506 = vrot.lane.b32.xlu2 %v498_v12, %s1121_s7 }
  0xce   : > { %512 = vrot.lane.b32.xlu2 %v505_v14, %s1121_s7 }
  0xe8   : > { %v265_v27 = vpop.permute.xlu2 %264 }
  0xf0   : > { %v267_v30 = vpop.permute.xlu2 %266 }
  0xf1   : > { %v273_v37 = vsel %vm272_vm11, %v265_v27, %v267_v30  ;;  %v1093_v27 = vld [vmem:[%s1629_s3] ss:$0 sm:$0xff] }
  0xf2   : > { %v277_v42 = vadd.f32 %v273_v37, %v244_v38 }
  0xf8   : > { %v298_v34 = vpop.permute.xlu2 %297 }
 0x100   : > { %v359_v40 = vpop.permute.xlu2 %358  ;;  %v294_v41 = vpop.permute.xlu0 %293 }
 0x101   : > { %v296_v43 = vpop.permute.xlu1 %295 }
 0x102   : > { %v302_v44 = vsel %vm301_vm12, %v294_v41, %v296_v43 }
 0x103   : > { %v306_v46 = vadd.f32 %v302_v44, %v277_v42 }
 0x105   : > { %v326_v47 = vadd.f32 %v1295_v17, %v306_v46 }
 0x108   : > { %v269_v48 = vpop.permute.xlu0 %268  ;;  %v365_v50 = vpop.permute.xlu2 %364 }
 0x109   : > { %v271_v49 = vpop.permute.xlu1 %270 }
 0x10a   : > { %v274_v52 = vsel %vm272_vm11, %v269_v48, %v271_v49 }
 0x10b   : > { %v278_v54 = vadd.f32 %v274_v52, %v245_v53 }
 0x110   : > { %v300_v55 = vpop.permute.xlu0 %299  ;;  %v403_v58 = vpop.permute.xlu2 %402 }
 0x111   : > { %v363_v31 = vpop.permute.xlu1 %362  ;;  %v303_v56 = vsel %vm301_vm12, %v298_v34, %v300_v55 }
 0x112   : > { %v307_v57 = vadd.f32 %v303_v56, %v278_v54  ;;  %v367_v3 = vsel %vm272_vm11, %v363_v31, %v365_v50 }
 0x114   : > { %v327_v59 = vadd.f32 %v1292_v16, %v307_v57 }
 0x116   : > { %v371_v6 = vadd.f32 %v367_v3, %v327_v59 }
 0x118   : > { %v361_v60 = vpop.permute.xlu0 %360  ;;  %v469_v2 = vpop.permute.xlu2 %468 }
 0x119   : > { %v401_v62 = vpop.permute.xlu1 %400  ;;  %v366_v17 = vsel %vm272_vm11, %v359_v40, %v361_v60 }
 0x11a   : > { %v370_v63 = vadd.f32 %v366_v17, %v326_v47  ;;  %v408_v0 = vsel %vm301_vm12, %v401_v62, %v403_v58 }
 0x11c   : > { %v412_v1 = vadd.f32 %v408_v0, %v370_v63 }
 0x11e   : > { %v432_v36 = vadd.f32 %v1298_v18, %v412_v1 }
 0x120   : > { %v405_v4 = vpop.permute.xlu0 %404  ;;  %v507_v9 = vpop.permute.xlu2 %506 }
 0x121   : > { %v407_v5 = vpop.permute.xlu1 %406 }
 0x122   : > { %v409_v45 = vsel %vm301_vm12, %v405_v4, %v407_v5 }
 0x123   : > { %v413_v16 = vadd.f32 %v409_v45, %v371_v6 }
 0x125   : > { %v433_v8 = vadd.f32 %v1301_v19, %v413_v16 }
 0x128   : > { %v465_v10 = vpop.permute.xlu0 %464  ;;  %v513_v51 = vpop.permute.xlu2 %512 }
 0x129   : > { %v467_v11 = vpop.permute.xlu1 %466 }
 0x12a   : > { %v472_v22 = vsel %vm272_vm11, %v465_v10, %v467_v11 }
 0x12b   : > { %v476_v19 = vadd.f32 %v472_v22, %v432_v36 }
 0x130   : > { %v471_v12 = vpop.permute.xlu0 %470 }
 0x131   : > { %v511_v18 = vpop.permute.xlu1 %510  ;;  %v473_v39 = vsel %vm272_vm11, %v469_v2, %v471_v12 }
 0x132   : > { %v477_v14 = vadd.f32 %v473_v39, %v433_v8  ;;  %v515_v30 = vsel %vm301_vm12, %v511_v18, %v513_v51 }
 0x134   : > { %v519_v34 = vadd.f32 %v515_v30, %v477_v14 }
 0x136   : > { %v523_v35 = vadd.f32 %v1093_v27, %v519_v34 }
 0x138   : > { %v509_v37 = vpop.permute.xlu0 %508  ;;  %v525_v38 = vmax.f32 %v523_v35, 0.0 }
 0x139   : > { %v514_v40 = vsel %vm301_vm12, %v507_v9, %v509_v37  ;;  %vm921_vm12 = vcmask 941056  }
 0x13a   : > { %v518_v41 = vadd.f32 %v514_v40, %v476_v19  ;;  %v527_v42 = vmin.f32 %v525_v38, 6.0 }
 0x13c   : > { %v522_v43 = vadd.f32 %v1093_v27, %v518_v41  ;;  %532 = vrot.lane.b32.xlu1 %v527_v42, %s1110_s5 }
 0x13e   : > { %v524_v44 = vmax.f32 %v522_v43, 0.0 }
 0x140   : > { %v526_v46 = vmin.f32 %v524_v44, 6.0 }
 0x142   : > { %530 = vrot.lane.b32.xlu0 %v526_v46, %s1110_s5  ;;  %s1122_s5 = smov 126  }
 0x1ae   : > { %v533_v47 = vpop.permute.xlu1 %532 }
 0x1af   : > { %540 = vst.msk [vmem:[#allocation3 + $0x10] sm:$0xff] %vm536_vm14, %v533_v47 }
 0x1b0   : > { %541 = vst.msk [vmem:[#allocation3 + $0x18] sm:$0xff] %vm538_vm15, %v533_v47 }
 0x1b4   : > { %v531_v48 = vpop.permute.xlu0 %530 }
 0x1b5   : > { %537 = vst.msk [vmem:[#allocation3] sm:$0xff] %vm536_vm14, %v531_v48 }
 0x1b6   : > { %539 = vst.msk [vmem:[#allocation3 + $0x8] sm:$0xff] %vm538_vm15, %v531_v48  ;;  %v1483_v12 = vld [vmem:[#allocation3 + $0x10] sm:$0xff] }
 0x1b7   : > { %v1485_v18 = vld [vmem:[#allocation3 + $0x18] sm:$0xff]  ;;  %v560_v39 = vmul.f32 %v1327_v61, %v1483_v12  ;;  %v589_v14 = vmul.f32 %v1348_v15, %v1483_v12  ;;  %v618_v30 = vmul.f32 %v1352_v21, %v1483_v12  ;;  %v705_v19 = vmul.f32 %v1358_v25, %v1483_v12 }
 0x1b8   : > { %v561_v51 = vmul.f32 %v1327_v61, %v1485_v18  ;;  %v590_v27 = vmul.f32 %v1348_v15, %v1485_v18  ;;  %v619_v34 = vmul.f32 %v1352_v21, %v1485_v18  ;;  %v648_v22 = vmul.f32 %v1338_v7, %v1485_v18 }
 0x1b9   : > { %v677_v35 = vmul.f32 %v1354_v23, %v1485_v18  ;;  %v706_v37 = vmul.f32 %v1358_v25, %v1485_v18  ;;  %v734_v38 = vmul.f32 %v1344_v13, %v1483_v12  ;;  %v735_v40 = vmul.f32 %v1344_v13, %v1485_v18 }
 0x1ba   : > { %v764_v41 = vmul.f32 %v1360_v26, %v1485_v18  ;;  %v792_v42 = vmul.f32 %v1350_v20, %v1485_v18  ;;  %v821_v43 = vmul.f32 %v1362_v28, %v1485_v18 }
 0x1bc   : > { %v1398_v49 = vld [vmem:[#allocation3] sm:$0xff] }
 0x1bd   : > { %v1400_v50 = vld [vmem:[#allocation3 + $0x8] sm:$0xff]  ;;  %v587_v52 = vmul.f32 %v1348_v15, %v1398_v49  ;;  %v558_v53 = vmul.f32 %v1327_v61, %v1398_v49  ;;  %v616_v56 = vmul.f32 %v1352_v21, %v1398_v49  ;;  %v674_v57 = vmul.f32 %v1354_v23, %v1398_v49 }
 0x1be   : > { %v559_v54 = vmul.f32 %v1327_v61, %v1400_v50  ;;  %v617_v55 = vmul.f32 %v1352_v21, %v1400_v50  ;;  %v588_v31 = vmul.f32 %v1348_v15, %v1400_v50  ;;  %v645_v58 = vmul.f32 %v1338_v7, %v1398_v49 }
 0x1bf   : > { %595 = vrot.lane.b32.xlu2 %v587_v52, %s1122_s5  ;;  %566 = vrot.lane.b32.xlu0 %v558_v53, %s1123_s18  ;;  %v646_v59 = vmul.f32 %v1338_v7, %v1400_v50  ;;  %v704_v60 = vmul.f32 %v1358_v25, %v1400_v50  ;;  %v675_v62 = vmul.f32 %v1354_v23, %v1400_v50 }
 0x1c0   : > { %568 = vrot.lane.b32.xlu1 %v559_v54, %s1123_s18  ;;  %v703_v17 = vmul.f32 %v1358_v25, %v1398_v49  ;;  %v761_v63 = vmul.f32 %v1360_v26, %v1398_v49  ;;  %v732_v0 = vmul.f32 %v1344_v13, %v1398_v49  ;;  %v733_v1 = vmul.f32 %v1344_v13, %v1400_v50  ;;  %v1544_v13 = vld [vmem:[%s1628_s2] ss:$0 sm:$0xff] }
 0x1c1   : > { %v819_v2 = vmul.f32 %v1362_v28, %v1400_v50  ;;  %v762_v36 = vmul.f32 %v1360_v26, %v1400_v50  ;;  %v790_v3 = vmul.f32 %v1350_v20, %v1400_v50  ;;  %v847_v4 = vmul.f32 %v1364_v29, %v1398_v49 }
 0x1c2   : > { %v789_v5 = vmul.f32 %v1350_v20, %v1398_v49  ;;  %v818_v6 = vmul.f32 %v1362_v28, %v1398_v49  ;;  %v906_v45 = vmul.f32 %v1366_v32, %v1400_v50  ;;  %v848_v16 = vmul.f32 %v1364_v29, %v1400_v50 }
 0x1c3   : > { %v877_v8 = vmul.f32 %v1356_v24, %v1400_v50  ;;  %v934_v9 = vmul.f32 %v1368_v33, %v1398_v49  ;;  %v876_v10 = vmul.f32 %v1356_v24, %v1398_v49  ;;  %v905_v11 = vmul.f32 %v1366_v32, %v1398_v49 }
 0x1c4   : > { %v647_v61 = vmul.f32 %v1338_v7, %v1483_v12  ;;  %v676_v15 = vmul.f32 %v1354_v23, %v1483_v12  ;;  %v763_v23 = vmul.f32 %v1360_v26, %v1483_v12  ;;  %v546_v47 = vmul.f32 %v1544_v13, %v1398_v49 }
 0x1c5   : > { %v791_v53 = vmul.f32 %v1350_v20, %v1483_v12  ;;  %v820_v54 = vmul.f32 %v1362_v28, %v1483_v12  ;;  %v850_v28 = vmul.f32 %v1364_v29, %v1485_v18 }
 0x1c7   : > { %626 = vrot.lane.b32.xlu2 %v617_v55, %s1124_s21  ;;  %597 = vrot.lane.b32.xlu0 %v588_v31, %s1122_s5  ;;  %v849_v55 = vmul.f32 %v1364_v29, %v1483_v12 }
 0x1c8   : > { %624 = vrot.lane.b32.xlu1 %v616_v56, %s1124_s21 }
 0x1cf   : > { %682 = vrot.lane.b32.xlu2 %v674_v57, %s1125_s19  ;;  %653 = vrot.lane.b32.xlu0 %v645_v58, %s1126_s22 }
 0x1d0   : > { %655 = vrot.lane.b32.xlu1 %v646_v59, %s1126_s22  ;;  %v879_v59 = vmul.f32 %v1356_v24, %v1485_v18 }
 0x1d7   : > { %713 = vrot.lane.b32.xlu2 %v704_v60, %s1127_s23  ;;  %684 = vrot.lane.b32.xlu0 %v675_v62, %s1125_s19  ;;  %v908_v62 = vmul.f32 %v1366_v32, %v1485_v18 }
 0x1d8   : > { %711 = vrot.lane.b32.xlu1 %v703_v17, %s1127_s23 }
 0x1df   : > { %769 = vrot.lane.b32.xlu2 %v761_v63, %s1120_s6  ;;  %740 = vrot.lane.b32.xlu0 %v732_v0, %s1128_s24 }
 0x1e0   : > { %742 = vrot.lane.b32.xlu1 %v733_v1, %s1128_s24 }
 0x1e7   : > { %828 = vrot.lane.b32.xlu2 %v819_v2, %s1129_s25  ;;  %771 = vrot.lane.b32.xlu0 %v762_v36, %s1120_s6  ;;  %v878_v2 = vmul.f32 %v1356_v24, %v1483_v12  ;;  %v907_v36 = vmul.f32 %v1366_v32, %v1483_v12  ;;  %v937_v32 = vmul.f32 %v1368_v33, %v1485_v18 }
 0x1e8   : > { %799 = vrot.lane.b32.xlu1 %v790_v3, %s1130_s26  ;;  %v936_v3 = vmul.f32 %v1368_v33, %v1483_v12 }
 0x1ef   : > { %855 = vrot.lane.b32.xlu2 %v847_v4, %s1131_s27  ;;  %797 = vrot.lane.b32.xlu0 %v789_v5, %s1130_s26 }
 0x1f0   : > { %826 = vrot.lane.b32.xlu1 %v818_v6, %s1129_s25 }
 0x1f7   : > { %915 = vrot.lane.b32.xlu2 %v906_v45, %s1132_s28  ;;  %857 = vrot.lane.b32.xlu0 %v848_v16, %s1131_s27 }
 0x1f8   : > { %886 = vrot.lane.b32.xlu1 %v877_v8, %s1133_s29  ;;  %v935_v8 = vmul.f32 %v1368_v33, %v1400_v50 }
 0x1ff   : > { %942 = vrot.lane.b32.xlu2 %v934_v9, %s1134_s30  ;;  %884 = vrot.lane.b32.xlu0 %v876_v10, %s1133_s29 }
 0x200   : > { %913 = vrot.lane.b32.xlu1 %v905_v11, %s1132_s28 }
 0x207   : > { %570 = vrot.lane.b32.xlu2 %v560_v39, %s1123_s18  ;;  %572 = vrot.lane.b32.xlu0 %v561_v51, %s1123_s18 }
 0x208   : > { %599 = vrot.lane.b32.xlu1 %v589_v14, %s1122_s5 }
 0x20f   : > { %601 = vrot.lane.b32.xlu2 %v590_v27, %s1122_s5  ;;  %628 = vrot.lane.b32.xlu0 %v618_v30, %s1124_s21 }
 0x210   : > { %630 = vrot.lane.b32.xlu1 %v619_v34, %s1124_s21 }
 0x217   : > { %657 = vrot.lane.b32.xlu2 %v647_v61, %s1126_s22  ;;  %659 = vrot.lane.b32.xlu0 %v648_v22, %s1126_s22 }
 0x218   : > { %686 = vrot.lane.b32.xlu1 %v676_v15, %s1125_s19 }
 0x219   : > { %v596_v21 = vpop.permute.xlu2 %595 }
 0x21f   : > { %688 = vrot.lane.b32.xlu2 %v677_v35, %s1125_s19  ;;  %715 = vrot.lane.b32.xlu0 %v705_v19, %s1127_s23 }
 0x220   : > { %717 = vrot.lane.b32.xlu1 %v706_v37, %s1127_s23 }
 0x221   : > { %v627_v7 = vpop.permute.xlu2 %626 }
 0x227   : > { %744 = vrot.lane.b32.xlu2 %v734_v38, %s1128_s24  ;;  %746 = vrot.lane.b32.xlu0 %v735_v40, %s1128_s24 }
 0x228   : > { %773 = vrot.lane.b32.xlu1 %v763_v23, %s1120_s6 }
 0x229   : > { %v683_v25 = vpop.permute.xlu2 %682 }
 0x22f   : > { %775 = vrot.lane.b32.xlu2 %v764_v41, %s1120_s6  ;;  %803 = vrot.lane.b32.xlu0 %v792_v42, %s1130_s26 }
 0x230   : > { %832 = vrot.lane.b32.xlu1 %v821_v43, %s1129_s25 }
 0x231   : > { %v714_v44 = vpop.permute.xlu2 %713  ;;  %v567_v26 = vpop.permute.xlu0 %566 }
 0x232   : > { %v569_v46 = vpop.permute.xlu1 %568 }
 0x233   : > { %v575_v48 = vsel %vm574_vm0, %v567_v26, %v569_v46 }
 0x234   : > { %v579_v52 = vadd.f32 %v575_v48, %v546_v47 }
 0x237   : > { %801 = vrot.lane.b32.xlu2 %v791_v53, %s1130_s26  ;;  %830 = vrot.lane.b32.xlu0 %v820_v54, %s1129_s25 }
 0x238   : > { %859 = vrot.lane.b32.xlu1 %v849_v55, %s1131_s27 }
 0x239   : > { %v770_v49 = vpop.permute.xlu2 %769  ;;  %v598_v31 = vpop.permute.xlu0 %597 }
 0x23a   : > { %v625_v56 = vpop.permute.xlu1 %624  ;;  %v604_v57 = vsel %vm603_vm1, %v596_v21, %v598_v31 }
 0x23b   : > { %v633_v20 = vsel %vm632_vm2, %v625_v56, %v627_v7  ;;  %v608_v58 = vadd.f32 %v604_v57, %v579_v52 }
 0x23d   : > { %v637_v60 = vadd.f32 %v633_v20, %v608_v58 }
 0x23f   : > { %861 = vrot.lane.b32.xlu2 %v850_v28, %s1131_s27  ;;  %890 = vrot.lane.b32.xlu0 %v879_v59, %s1133_s29  ;;  %v547_v28 = vmul.f32 %v1544_v13, %v1483_v12 }
 0x240   : > { %919 = vrot.lane.b32.xlu1 %v908_v62, %s1132_s28 }
 0x241   : > { %v829_v17 = vpop.permute.xlu2 %828  ;;  %v654_v63 = vpop.permute.xlu0 %653 }
 0x242   : > { %v656_v0 = vpop.permute.xlu1 %655 }
 0x243   : > { %v662_v1 = vsel %vm661_vm3, %v654_v63, %v656_v0 }
 0x244   : > { %v666_v29 = vadd.f32 %v662_v1, %v637_v60 }
 0x247   : > { %888 = vrot.lane.b32.xlu2 %v878_v2, %s1133_s29  ;;  %917 = vrot.lane.b32.xlu0 %v907_v36, %s1132_s28 }
 0x248   : > { %946 = vrot.lane.b32.xlu1 %v936_v3, %s1134_s30 }
 0x249   : > { %v856_v4 = vpop.permute.xlu2 %855  ;;  %v685_v5 = vpop.permute.xlu0 %684 }
 0x24a   : > { %v712_v6 = vpop.permute.xlu1 %711  ;;  %v691_v45 = vsel %vm690_vm4, %v683_v25, %v685_v5 }
 0x24b   : > { %v720_v24 = vsel %vm719_vm5, %v712_v6, %v714_v44  ;;  %v695_v16 = vadd.f32 %v691_v45, %v666_v29 }
 0x24d   : > { %v724_v9 = vadd.f32 %v720_v24, %v695_v16 }
 0x24f   : > { %948 = vrot.lane.b32.xlu2 %v937_v32, %s1134_s30  ;;  %944 = vrot.lane.b32.xlu0 %v935_v8, %s1134_s30 }
 0x251   : > { %v916_v10 = vpop.permute.xlu2 %915  ;;  %v741_v11 = vpop.permute.xlu0 %740 }
 0x252   : > { %v743_v39 = vpop.permute.xlu1 %742 }
 0x253   : > { %v749_v51 = vsel %vm748_vm6, %v741_v11, %v743_v39 }
 0x254   : > { %v753_v14 = vadd.f32 %v749_v51, %v724_v9 }
 0x259   : > { %v1588_v27 = vpop.permute.xlu2 %942  ;;  %v772_v30 = vpop.permute.xlu0 %771 }
 0x25a   : > { %v800_v34 = vpop.permute.xlu1 %799  ;;  %v777_v18 = vsel %vm272_vm11, %v770_v49, %v772_v30 }
 0x25b   : > { %v781_v61 = vadd.f32 %v777_v18, %v753_v14 }
 0x261   : > { %v571_v33 = vpop.permute.xlu2 %570  ;;  %v798_v50 = vpop.permute.xlu0 %797 }
 0x262   : > { %v827_v22 = vpop.permute.xlu1 %826  ;;  %v806_v15 = vsel %vm805_vm7, %v798_v50, %v800_v34 }
 0x263   : > { %v835_v21 = vsel %vm834_vm8, %v827_v22, %v829_v17  ;;  %v810_v35 = vadd.f32 %v806_v15, %v781_v61 }
 0x265   : > { %v839_v19 = vadd.f32 %v835_v21, %v810_v35 }
 0x269   : > { %v858_v37 = vpop.permute.xlu0 %857  ;;  %v602_v40 = vpop.permute.xlu2 %601 }
 0x26a   : > { %v887_v7 = vpop.permute.xlu1 %886  ;;  %v864_v38 = vsel %vm863_vm9, %v856_v4, %v858_v37  ;;  %v1095_v37 = vld [vmem:[%s1629_s3 + $0x1] ss:$0 sm:$0xff] }
 0x26b   : > { %v868_v23 = vadd.f32 %v864_v38, %v839_v19 }
 0x271   : > { %v885_v25 = vpop.permute.xlu0 %884  ;;  %v658_v26 = vpop.permute.xlu2 %657 }
 0x272   : > { %v914_v41 = vpop.permute.xlu1 %913  ;;  %v893_v42 = vsel %vm892_vm10, %v885_v25, %v887_v7 }
 0x273   : > { %v922_v43 = vsel %vm921_vm12, %v914_v41, %v916_v10  ;;  %v897_v44 = vadd.f32 %v893_v42, %v868_v23 }
 0x275   : > { %v1596_v46 = vadd.f32 %v922_v43, %v897_v44 }
 0x279   : > { %v573_v47 = vpop.permute.xlu0 %572  ;;  %v689_v52 = vpop.permute.xlu2 %688 }
 0x27a   : > { %v600_v48 = vpop.permute.xlu1 %599  ;;  %v576_v58 = vsel %vm574_vm0, %v571_v33, %v573_v47 }
 0x27b   : > { %v580_v62 = vadd.f32 %v576_v58, %v547_v28  ;;  %v605_v63 = vsel %vm603_vm1, %v600_v48, %v602_v40 }
 0x27d   : > { %v609_v1 = vadd.f32 %v605_v63, %v580_v62 }
 0x281   : > { %v629_v53 = vpop.permute.xlu0 %628  ;;  %v745_v55 = vpop.permute.xlu2 %744 }
 0x282   : > { %v631_v54 = vpop.permute.xlu1 %630 }
 0x283   : > { %v634_v0 = vsel %vm632_vm2, %v629_v53, %v631_v54 }
 0x284   : > { %v638_v2 = vadd.f32 %v634_v0, %v609_v1 }
 0x289   : > { %v660_v49 = vpop.permute.xlu0 %659  ;;  %v776_v20 = vpop.permute.xlu2 %775 }
 0x28a   : > { %v687_v31 = vpop.permute.xlu1 %686  ;;  %v663_v29 = vsel %vm661_vm3, %v658_v26, %v660_v49 }
 0x28b   : > { %v667_v4 = vadd.f32 %v663_v29, %v638_v2  ;;  %v692_v5 = vsel %vm690_vm4, %v687_v31, %v689_v52 }
 0x28d   : > { %v696_v12 = vadd.f32 %v692_v5, %v667_v4 }
 0x291   : > { %v716_v56 = vpop.permute.xlu0 %715  ;;  %v802_v17 = vpop.permute.xlu2 %801 }
 0x292   : > { %v718_v57 = vpop.permute.xlu1 %717 }
 0x293   : > { %v721_v6 = vsel %vm719_vm5, %v716_v56, %v718_v57 }
 0x294   : > { %v725_v24 = vadd.f32 %v721_v6, %v696_v12 }
 0x299   : > { %v747_v59 = vpop.permute.xlu0 %746  ;;  %v862_v13 = vpop.permute.xlu2 %861 }
 0x29a   : > { %v774_v60 = vpop.permute.xlu1 %773  ;;  %v750_v45 = vsel %vm748_vm6, %v745_v55, %v747_v59 }
 0x29b   : > { %v754_v8 = vadd.f32 %v750_v45, %v725_v24  ;;  %v778_v9 = vsel %vm272_vm11, %v774_v60, %v776_v20 }
 0x29d   : > { %v782_v11 = vadd.f32 %v778_v9, %v754_v8 }
 0x2a1   : > { %v804_v36 = vpop.permute.xlu0 %803  ;;  %v889_v51 = vpop.permute.xlu2 %888 }
 0x2a2   : > { %v833_v3 = vpop.permute.xlu1 %832  ;;  %v807_v10 = vsel %vm805_vm7, %v802_v17, %v804_v36 }
 0x2a3   : > { %v811_v14 = vadd.f32 %v807_v10, %v782_v11 }
 0x2a9   : > { %v831_v16 = vpop.permute.xlu0 %830  ;;  %v949_v19 = vpop.permute.xlu2 %948 }
 0x2aa   : > { %v860_v32 = vpop.permute.xlu1 %859  ;;  %v836_v39 = vsel %vm834_vm8, %v831_v16, %v833_v3 }
 0x2ab   : > { %v840_v18 = vadd.f32 %v836_v39, %v811_v14  ;;  %v865_v61 = vsel %vm863_vm9, %v860_v32, %v862_v13 }
 0x2ad   : > { %v869_v50 = vadd.f32 %v865_v61, %v840_v18 }
 0x2b1   : > { %v891_v30 = vpop.permute.xlu0 %890 }
 0x2b2   : > { %v920_v34 = vpop.permute.xlu1 %919  ;;  %v894_v33 = vsel %vm892_vm10, %v889_v51, %v891_v30 }
 0x2b3   : > { %v898_v22 = vadd.f32 %v894_v33, %v869_v50 }
 0x2b9   : > { %v918_v15 = vpop.permute.xlu0 %917 }
 0x2ba   : > { %v947_v21 = vpop.permute.xlu1 %946  ;;  %v923_v35 = vsel %vm921_vm12, %v918_v15, %v920_v34 }
 0x2bb   : > { %v927_v7 = vadd.f32 %v923_v35, %v898_v22  ;;  %v952_v38 = vsel %vm950_vm13, %v947_v21, %v949_v19 }
 0x2bd   : > { %v956_v40 = vadd.f32 %v952_v38, %v927_v7 }
 0x2bf   : > { %v960_v23 = vadd.f32 %v1095_v37, %v956_v40 }
 0x2c1   : > { %962 = vst [vmem:[%s197_s12 + $0x8] sm:$0xff] %v960_v23  ;;  %v945_v25 = vpop.permute.xlu0 %944 }
 0x2c2   : > { %v951_v41 = vsel %vm950_vm13, %v1588_v27, %v945_v25 }
 0x2c3   : > { %v955_v42 = vadd.f32 %v951_v41, %v1596_v46 }
 0x2c5   : > { %v959_v43 = vadd.f32 %v1095_v37, %v955_v42 }
 0x2c7   : > { %961 = vst [vmem:[%s197_s12] sm:$0xff] %v959_v43 }
 0x2c8 PF: > { %s14_s15 = sadd.s32 1, %s1102_s15  }
 0x2c9   : > { %p11_p4 = scmp.ge.s32.totalorder %s14_s15, 4  }
 0x2cb   :  { %13 = sbr.rel (!%p11_p4) target bundleno = 1 (0x1), region = 66 }

</bundles_post_ra>
